<compile_context>
chip_gen: v7x
topology: tpu7x:2x2x1
jax: 0.10.0
libtpu: 0.0.40
codegen_flags: <defaults>
</compile_context>

<pallas_src>
import math

import jax
import jax.numpy as jnp
from jax.experimental import pallas as pl
from jax.experimental.pallas import tpu as pltpu

# ----------------------------- tiny BERT config -----------------------------

VOCAB = 128
MAX_POS = 16
TYPE_VOCAB = 2
HIDDEN = 32
NUM_LAYERS = 2
NUM_HEADS = 4
HEAD_DIM = HIDDEN // NUM_HEADS
INTERMEDIATE = 64
NUM_LABELS = 3
LANE = 128          # lane-dense padded width of the logits output slab


# ----------------------------- fused Pallas kernel -----------------------------

def _make_fused_bert_kernel(Bb, S):
    """Kernel processing one batch-block of Bb sequences (Bb*S token rows)."""
    H, NH, D, L = HIDDEN, NUM_HEADS, HEAD_DIM, NUM_LAYERS
    R = Bb * S
    c_gelu = math.sqrt(2.0 / math.pi)
    bf16 = jnp.bfloat16

    def mm(x, w):
        # bf16 MXU operands (weights already bf16), f32 accumulation.
        return jnp.dot(x.astype(bf16), w, preferred_element_type=jnp.float32)

    def layernorm(x, g, b):
        mu = jnp.mean(x, axis=-1, keepdims=True)
        var = jnp.mean((x - mu) ** 2, axis=-1, keepdims=True)
        return (x - mu) * jax.lax.rsqrt(var + 1e-12) * g + b

    def gelu_tanh(x):
        # tanh-approx GELU; HF default uses exact erf GELU (~1e-3 relative deviation).
        return 0.5 * x * (1.0 + jnp.tanh(c_gelu * (x + 0.044715 * x * x * x)))

    def kernel(emb_ref, mask_ref,
               emb_ln_g_ref, emb_ln_b_ref,
               wqkv_ref, bqkv_ref, wo_ref, bo_ref,
               ln1_g_ref, ln1_b_ref,
               w1_ref, b1_ref, w2_ref, b2_ref,
               ln2_g_ref, ln2_b_ref,
               pool_w_ref, pool_b_ref,
               cls_w_ref, cls_b_ref,
               out_ref):
        # additive mask, replicated across heads: batch-of-heads layout is head-major,
        # sequence-minor (index = h*Bb + b), matching the qkv reshape below.
        mask = mask_ref[...]                                            # (Bb, 1, S)
        mask_hb = jnp.broadcast_to(mask[None], (NH, Bb, 1, S)).reshape(NH * Bb, 1, S)

        h = layernorm(emb_ref[...], emb_ln_g_ref[...], emb_ln_b_ref[...])   # (R, H) f32

        for l in range(L):
            # ---- multi-head QKV projection: heads batched on the leading dim ----
            hb = jnp.broadcast_to(h.astype(bf16)[None], (NH, R, H))
            qkv = jnp.einsum("hmk,hkn->hmn", hb, wqkv_ref[l],
                             preferred_element_type=jnp.float32) + bqkv_ref[l]  # (NH,R,3D)
            # split rows back into (sequence, token): S == 8 sublanes -> tile-aligned, free
            qkv = qkv.reshape(NH, Bb, S, 3 * D).reshape(NH * Bb, S, 3 * D)
            q = qkv[:, :, :D].astype(bf16)             # scale already folded into wq/bq
            k = qkv[:, :, D:2 * D].astype(bf16)
            v = qkv[:, :, 2 * D:].astype(bf16)

            # ---- batched attention over all (head, sequence) pairs ----
            s = jnp.einsum("bqd,bkd->bqk", q, k,
                           preferred_element_type=jnp.float32) + mask_hb
            s = s - jnp.max(s, axis=-1, keepdims=True)
            p = jnp.exp(s)
            p = p * pl.reciprocal(jnp.sum(p, axis=-1, keepdims=True), approx=True)
            ctx = jnp.einsum("bqk,bkd->bqd", p.astype(bf16), v,
                             preferred_element_type=jnp.float32)        # (NH*Bb, S, D)

            # ---- output projection: per-head matmul summed over heads (== concat @ Wo) ----
            ctx = ctx.reshape(NH, Bb, S, D).reshape(NH, R, D).astype(bf16)
            attn = jnp.einsum("hmd,hdn->hmn", ctx, wo_ref[l],
                              preferred_element_type=jnp.float32)       # (NH, R, H)
            attn_out = jnp.sum(attn, axis=0) + bo_ref[l]                # (R, H)
            h = layernorm(attn_out + h, ln1_g_ref[l], ln1_b_ref[l])

            # ---- feed-forward ----
            ff = gelu_tanh(mm(h, w1_ref[l]) + b1_ref[l])
            ff = mm(ff, w2_ref[l]) + b2_ref[l]
            h = layernorm(ff + h, ln2_g_ref[l], ln2_b_ref[l])

        # pooler + classifier computed for every token row so the output slab stays
        # sublane/lane dense; wrapper keeps only CLS rows & the first NUM_LABELS lanes.
        pooled = jnp.tanh(mm(h, pool_w_ref[...]) + pool_b_ref[...])     # (R, H)
        out_ref[...] = mm(pooled, cls_w_ref[...]) + cls_b_ref[...]      # (R, LANE)

    return kernel


def _pick_batch_block(B, S):
    """Rows per grid step: aim for >=128 (MXU-friendly M), but keep >=2 grid steps
    when possible so a "parallel" axis exists for v7x megacore sharding."""
    target = max(1, 128 // S)
    divisors = [d for d in range(1, B + 1) if B % d == 0]
    at_or_under = [d for d in divisors if d <= target]
    bblk = max(at_or_under) if at_or_under else min(divisors)
    if bblk == B and B > 1:
        smaller = [d for d in divisors if d < B]
        if smaller:
            bblk = max(smaller)
    return bblk


def _const_block_spec(arr):
    zeros = (0,) * arr.ndim
    return pl.BlockSpec(arr.shape, lambda i, _z=zeros: _z)


def fused_bert_logits(packed, emb2d, add_mask, B, S):
    b_blk = _pick_batch_block(B, S)
    nblk = B // b_blk
    rows = b_blk * S
    kernel = _make_fused_bert_kernel(b_blk, S)

    weights = (
        packed["emb_ln_g"], packed["emb_ln_b"],
        packed["wqkv"], packed["bqkv"], packed["wo"], packed["bo"],
        packed["ln1_g"], packed["ln1_b"],
        packed["w1"], packed["b1"], packed["w2"], packed["b2"],
        packed["ln2_g"], packed["ln2_b"],
        packed["pool_w"], packed["pool_b"],
        packed["cls_w"], packed["cls_b"],
    )

    in_specs = (
        [pl.BlockSpec((rows, HIDDEN), lambda i: (i, 0)),        # token-row block
         pl.BlockSpec((b_blk, 1, S), lambda i: (i, 0, 0))]      # per-sequence mask block
        + [_const_block_spec(w) for w in weights]               # VMEM-resident weights
    )

    out = pl.pallas_call(
        kernel,
        grid=(nblk,),
        out_shape=jax.ShapeDtypeStruct((B * S, LANE), jnp.float32),
        in_specs=in_specs,
        out_specs=pl.BlockSpec((rows, LANE), lambda i: (i, 0)),
        compiler_params=pltpu.CompilerParams(
            dimension_semantics=("parallel",),          # shard batch blocks across TCs (v7x)
            vmem_limit_bytes=32 * 1024 * 1024,          # explicit budget, safe on v7x 64 MiB
        ),
    )(emb2d, add_mask, *weights)
    # CLS rows (token 0 of each sequence), un-pad the lane dimension.
    return out[::S, :NUM_LABELS]


# ----------------------------- parameters -----------------------------

def init_params(key):
    std = 0.02
    params = {}

    def nrm(k, shape):
        return std * jax.random.normal(k, shape, dtype=jnp.float32)

    keys = iter(jax.random.split(key, 6 + NUM_LAYERS * 16))
    params["word_emb"] = nrm(next(keys), (VOCAB, HIDDEN))
    params["pos_emb"] = nrm(next(keys), (MAX_POS, HIDDEN))
    params["type_emb"] = nrm(next(keys), (TYPE_VOCAB, HIDDEN))
    params["emb_ln_g"] = jnp.ones((HIDDEN,), jnp.float32)
    params["emb_ln_b"] = jnp.zeros((HIDDEN,), jnp.float32)

    layers = []
    for _ in range(NUM_LAYERS):
        layer = {
            "wq": nrm(next(keys), (HIDDEN, HIDDEN)), "bq": jnp.zeros((HIDDEN,), jnp.float32),
            "wk": nrm(next(keys), (HIDDEN, HIDDEN)), "bk": jnp.zeros((HIDDEN,), jnp.float32),
            "wv": nrm(next(keys), (HIDDEN, HIDDEN)), "bv": jnp.zeros((HIDDEN,), jnp.float32),
            "wo": nrm(next(keys), (HIDDEN, HIDDEN)), "bo": jnp.zeros((HIDDEN,), jnp.float32),
            "ln1_g": jnp.ones((HIDDEN,), jnp.float32), "ln1_b": jnp.zeros((HIDDEN,), jnp.float32),
            "w1": nrm(next(keys), (HIDDEN, INTERMEDIATE)), "b1": jnp.zeros((INTERMEDIATE,), jnp.float32),
            "w2": nrm(next(keys), (INTERMEDIATE, HIDDEN)), "b2": jnp.zeros((HIDDEN,), jnp.float32),
            "ln2_g": jnp.ones((HIDDEN,), jnp.float32), "ln2_b": jnp.zeros((HIDDEN,), jnp.float32),
        }
        layers.append(layer)
    params["layers"] = layers

    params["pooler_w"] = nrm(next(keys), (HIDDEN, HIDDEN))
    params["pooler_b"] = jnp.zeros((HIDDEN,), jnp.float32)
    params["cls_w"] = nrm(next(keys), (HIDDEN, NUM_LABELS))
    params["cls_b"] = jnp.zeros((NUM_LABELS,), jnp.float32)
    return params


def pack_params(params):
    """Per-head QKV/WO packing (head on a leading dim), attention scale folded into Q,
    matmul weights pre-cast to bf16, biases/LN in f32, classifier padded to 128 lanes."""
    L, ls = NUM_LAYERS, params["layers"]
    NH, D = NUM_HEADS, HEAD_DIM
    scale = 1.0 / math.sqrt(D)
    bf16 = jnp.bfloat16

    def per_head_qkv_w(l):
        wq, wk, wv = ls[l]["wq"] * scale, ls[l]["wk"], ls[l]["wv"]
        heads = []
        for hh in range(NH):
            sl = slice(hh * D, (hh + 1) * D)
            heads.append(jnp.concatenate([wq[:, sl], wk[:, sl], wv[:, sl]], axis=1))
        return jnp.stack(heads)                                   # (NH, H, 3D)

    def per_head_qkv_b(l):
        bq, bk, bv = ls[l]["bq"] * scale, ls[l]["bk"], ls[l]["bv"]
        heads = []
        for hh in range(NH):
            sl = slice(hh * D, (hh + 1) * D)
            heads.append(jnp.concatenate([bq[sl], bk[sl], bv[sl]]))
        return jnp.stack(heads)[:, None, :]                       # (NH, 1, 3D)

    def stack_w(name):
        return jnp.stack([ls[l][name] for l in range(L)])

    def stack_b(name):
        return jnp.stack([ls[l][name] for l in range(L)])[:, None, :]

    return {
        "emb_ln_g": params["emb_ln_g"][None, :],
        "emb_ln_b": params["emb_ln_b"][None, :],
        "wqkv": jnp.stack([per_head_qkv_w(l) for l in range(L)]).astype(bf16),   # (L,NH,H,3D)
        "bqkv": jnp.stack([per_head_qkv_b(l) for l in range(L)]),                # (L,NH,1,3D) f32
        "wo": jnp.stack([ls[l]["wo"].reshape(NH, D, HIDDEN) for l in range(L)]).astype(bf16),
        "bo": stack_b("bo"),
        "ln1_g": stack_b("ln1_g"), "ln1_b": stack_b("ln1_b"),
        "w1": stack_w("w1").astype(bf16), "b1": stack_b("b1"),
        "w2": stack_w("w2").astype(bf16), "b2": stack_b("b2"),
        "ln2_g": stack_b("ln2_g"), "ln2_b": stack_b("ln2_b"),
        "pool_w": params["pooler_w"].astype(bf16), "pool_b": params["pooler_b"][None, :],
        "cls_w": jnp.pad(params["cls_w"], ((0, 0), (0, LANE - NUM_LABELS))).astype(bf16),
        "cls_b": jnp.pad(params["cls_b"], (0, LANE - NUM_LABELS))[None, :],
    }


# ----------------------------- forward pass -----------------------------

def sentiment_classifier_forward(params, packed, input_ids, attention_mask, labels=None):
    B, S = input_ids.shape
    H = HIDDEN

    # embeddings (data-dependent gather kept as JAX glue)
    # TODO(synk): fuse the embedding gather in-kernel via PrefetchScalarGridSpec
    # (input_ids in SMEM, embedding tables VMEM-resident) to drop the XLA gather dispatch.
    word = jnp.take(params["word_emb"], input_ids, axis=0)           # (B,S,H)
    pos = params["pos_emb"][:S][None, :, :]                          # (1,S,H)
    typ = params["type_emb"][0][None, None, :]                       # token_type_ids == 0
    emb = (word + pos + typ).reshape(B * S, H).astype(jnp.float32)

    # additive attention mask (B,1,S): 0 for real tokens, -1e9 for padding
    add_mask = ((1.0 - attention_mask.astype(jnp.float32)) * -1e9)[:, None, :]

    logits = fused_bert_logits(packed, emb, add_mask, B, S)          # (B, NUM_LABELS)

    if labels is None:
        return logits
    # cross-entropy loss (glue, matches HF CrossEntropyLoss mean reduction)
    logp = jax.nn.log_softmax(logits, axis=-1)
    loss = -jnp.mean(jnp.take_along_axis(logp, labels[:, None], axis=-1))
    return loss, logits


# ----------------------------- main -----------------------------

if __name__ == "__main__":
    key = jax.random.PRNGKey(0)
    pkey, ikey = jax.random.split(key)
    params = init_params(pkey)
    packed = pack_params(params)

    B, S = 2, 8
    input_ids = jax.random.randint(ikey, (B, S), 0, VOCAB, dtype=jnp.int32)
    attention_mask = jnp.ones((B, S), dtype=jnp.int32).at[1, 6:].set(0)  # pad tail of seq 1
    labels = jnp.array([0, 2], dtype=jnp.int32)

    fwd = jax.jit(sentiment_classifier_forward)
    loss, logits = fwd(params, packed, input_ids, attention_mask, labels)
    jax.block_until_ready((loss, logits))
    assert logits.shape == (B, NUM_LABELS)
    assert bool(jnp.isfinite(loss))
    print("KERNEL_OK")
</pallas_src>

<mosaic_0001>
module attributes {stable_mosaic.version = 11 : i64} {
  func.func @kernel(%arg0: i32, %arg1: memref<8x32xf32, #tpu.memory_space<vmem>>, %arg2: memref<1x1x8xf32, #tpu.memory_space<vmem>>, %arg3: memref<1x32xf32, #tpu.memory_space<vmem>>, %arg4: memref<1x32xf32, #tpu.memory_space<vmem>>, %arg5: memref<2x4x32x24xbf16, #tpu.memory_space<vmem>>, %arg6: memref<2x4x1x24xf32, #tpu.memory_space<vmem>>, %arg7: memref<2x4x8x32xbf16, #tpu.memory_space<vmem>>, %arg8: memref<2x1x32xf32, #tpu.memory_space<vmem>>, %arg9: memref<2x1x32xf32, #tpu.memory_space<vmem>>, %arg10: memref<2x1x32xf32, #tpu.memory_space<vmem>>, %arg11: memref<2x32x64xbf16, #tpu.memory_space<vmem>>, %arg12: memref<2x1x64xf32, #tpu.memory_space<vmem>>, %arg13: memref<2x64x32xbf16, #tpu.memory_space<vmem>>, %arg14: memref<2x1x32xf32, #tpu.memory_space<vmem>>, %arg15: memref<2x1x32xf32, #tpu.memory_space<vmem>>, %arg16: memref<2x1x32xf32, #tpu.memory_space<vmem>>, %arg17: memref<32x32xbf16, #tpu.memory_space<vmem>>, %arg18: memref<1x32xf32, #tpu.memory_space<vmem>>, %arg19: memref<32x128xbf16, #tpu.memory_space<vmem>>, %arg20: memref<1x128xf32, #tpu.memory_space<vmem>>, %arg21: memref<8x128xf32, #tpu.memory_space<vmem>>) attributes {dimension_semantics = [#tpu.dimension_semantics<parallel>], iteration_bounds = array<i64: 2>, scalar_prefetch = 0 : i64, scratch_operands = 0 : i64, tpu.core_type = #tpu.core_type<tc>, window_params = [{transform_indices = @transform_0, window_bounds = array<i64: 8, 32>}, {transform_indices = @transform_1, window_bounds = array<i64: 1, 1, 8>}, {pipeline_mode = #tpu.pipeline_mode<synchronous>, transform_indices = @transform_2, window_bounds = array<i64: 1, 32>}, {pipeline_mode = #tpu.pipeline_mode<synchronous>, transform_indices = @transform_3, window_bounds = array<i64: 1, 32>}, {pipeline_mode = #tpu.pipeline_mode<synchronous>, transform_indices = @transform_4, window_bounds = array<i64: 2, 4, 32, 24>}, {pipeline_mode = #tpu.pipeline_mode<synchronous>, transform_indices = @transform_5, window_bounds = array<i64: 2, 4, 1, 24>}, {pipeline_mode = #tpu.pipeline_mode<synchronous>, transform_indices = @transform_6, window_bounds = array<i64: 2, 4, 8, 32>}, {pipeline_mode = #tpu.pipeline_mode<synchronous>, transform_indices = @transform_7, window_bounds = array<i64: 2, 1, 32>}, {pipeline_mode = #tpu.pipeline_mode<synchronous>, transform_indices = @transform_8, window_bounds = array<i64: 2, 1, 32>}, {pipeline_mode = #tpu.pipeline_mode<synchronous>, transform_indices = @transform_9, window_bounds = array<i64: 2, 1, 32>}, {pipeline_mode = #tpu.pipeline_mode<synchronous>, transform_indices = @transform_10, window_bounds = array<i64: 2, 32, 64>}, {pipeline_mode = #tpu.pipeline_mode<synchronous>, transform_indices = @transform_11, window_bounds = array<i64: 2, 1, 64>}, {pipeline_mode = #tpu.pipeline_mode<synchronous>, transform_indices = @transform_12, window_bounds = array<i64: 2, 64, 32>}, {pipeline_mode = #tpu.pipeline_mode<synchronous>, transform_indices = @transform_13, window_bounds = array<i64: 2, 1, 32>}, {pipeline_mode = #tpu.pipeline_mode<synchronous>, transform_indices = @transform_14, window_bounds = array<i64: 2, 1, 32>}, {pipeline_mode = #tpu.pipeline_mode<synchronous>, transform_indices = @transform_15, window_bounds = array<i64: 2, 1, 32>}, {pipeline_mode = #tpu.pipeline_mode<synchronous>, transform_indices = @transform_16, window_bounds = array<i64: 32, 32>}, {pipeline_mode = #tpu.pipeline_mode<synchronous>, transform_indices = @transform_17, window_bounds = array<i64: 1, 32>}, {pipeline_mode = #tpu.pipeline_mode<synchronous>, transform_indices = @transform_18, window_bounds = array<i64: 32, 128>}, {pipeline_mode = #tpu.pipeline_mode<synchronous>, transform_indices = @transform_19, window_bounds = array<i64: 1, 128>}, {transform_indices = @transform_20, window_bounds = array<i64: 8, 128>}]} {
    %c0 = arith.constant 0 : index
    %c0_0 = arith.constant 0 : index
    %c0_1 = arith.constant 0 : index
    %0 = vector.load %arg2[%c0, %c0_0, %c0_1] : memref<1x1x8xf32, #tpu.memory_space<vmem>>, vector<1x1x8xf32>
    %1 = vector.shape_cast %0 : vector<1x1x8xf32> to vector<1x1x1x8xf32>
    %2 = vector.shape_cast %1 : vector<1x1x1x8xf32> to vector<1x1x1x8xf32>
    %3 = vector.broadcast %2 : vector<1x1x1x8xf32> to vector<4x1x1x8xf32>
    %4 = vector.shape_cast %3 : vector<4x1x1x8xf32> to vector<4x1x8xf32>
    %c0_2 = arith.constant 0 : index
    %c0_3 = arith.constant 0 : index
    %5 = vector.load %arg1[%c0_2, %c0_3] : memref<8x32xf32, #tpu.memory_space<vmem>>, vector<8x32xf32>
    %c0_4 = arith.constant 0 : index
    %c0_5 = arith.constant 0 : index
    %6 = vector.load %arg3[%c0_4, %c0_5] : memref<1x32xf32, #tpu.memory_space<vmem>>, vector<1x32xf32>
    %c0_6 = arith.constant 0 : index
    %c0_7 = arith.constant 0 : index
    %7 = vector.load %arg4[%c0_6, %c0_7] : memref<1x32xf32, #tpu.memory_space<vmem>>, vector<1x32xf32>
    %cst = arith.constant dense<0.000000e+00> : vector<8xf32>
    %8 = vector.multi_reduction <add>, %5, %cst [1] : vector<8x32xf32> to vector<8xf32>
    %9 = vector.shape_cast %8 : vector<8xf32> to vector<8x1xf32>
    %cst_8 = arith.constant 3.200000e+01 : f32
    %10 = vector.broadcast %cst_8 : f32 to vector<8x1xf32>
    %11 = arith.divf %9, %10 : vector<8x1xf32>
    %12 = vector.broadcast %11 : vector<8x1xf32> to vector<8x32xf32>
    %13 = arith.subf %5, %12 : vector<8x32xf32>
    %14 = arith.mulf %13, %13 : vector<8x32xf32>
    %cst_9 = arith.constant dense<0.000000e+00> : vector<8xf32>
    %15 = vector.multi_reduction <add>, %14, %cst_9 [1] : vector<8x32xf32> to vector<8xf32>
    %16 = vector.shape_cast %15 : vector<8xf32> to vector<8x1xf32>
    %cst_10 = arith.constant 3.200000e+01 : f32
    %17 = vector.broadcast %cst_10 : f32 to vector<8x1xf32>
    %18 = arith.divf %16, %17 : vector<8x1xf32>
    %19 = vector.broadcast %11 : vector<8x1xf32> to vector<8x32xf32>
    %20 = arith.subf %5, %19 : vector<8x32xf32>
    %cst_11 = arith.constant 9.99999996E-13 : f32
    %21 = vector.broadcast %cst_11 : f32 to vector<8x1xf32>
    %22 = arith.addf %18, %21 : vector<8x1xf32>
    %23 = math.rsqrt %22 : vector<8x1xf32>
    %24 = vector.broadcast %23 : vector<8x1xf32> to vector<8x32xf32>
    %25 = arith.mulf %20, %24 : vector<8x32xf32>
    %26 = vector.broadcast %6 : vector<1x32xf32> to vector<8x32xf32>
    %27 = arith.mulf %25, %26 : vector<8x32xf32>
    %28 = vector.broadcast %7 : vector<1x32xf32> to vector<8x32xf32>
    %29 = arith.addf %27, %28 : vector<8x32xf32>
    %30 = arith.truncf %29 : vector<8x32xf32> to vector<8x32xbf16>
    %31 = vector.shape_cast %30 : vector<8x32xbf16> to vector<1x8x32xbf16>
    %32 = vector.shape_cast %31 : vector<1x8x32xbf16> to vector<1x8x32xbf16>
    %33 = vector.broadcast %32 : vector<1x8x32xbf16> to vector<4x8x32xbf16>
    %c0_12 = arith.constant 0 : index
    %c0_13 = arith.constant 0 : index
    %c0_14 = arith.constant 0 : index
    %c0_15 = arith.constant 0 : index
    %34 = vector.load %arg5[%c0_12, %c0_13, %c0_14, %c0_15] : memref<2x4x32x24xbf16, #tpu.memory_space<vmem>>, vector<1x4x32x24xbf16>
    %35 = vector.shape_cast %34 : vector<1x4x32x24xbf16> to vector<4x32x24xbf16>
    "tpu.trace_start"() <{level = 10 : i32, message = "hmk,hkn->hmn"}> : () -> ()
    %cst_16 = arith.constant dense<0.000000e+00> : vector<4x8x24xf32>
    %36 = tpu.matmul %33, %35, %cst_16 {dimension_numbers = #tpu.dot_dimension_numbers<[2], [1], [1], [2], [0, 0, 0, 1, 1, 2], [0], [0]>} : vector<4x8x32xbf16>, vector<4x32x24xbf16>, vector<4x8x24xf32> -> vector<4x8x24xf32>
    "tpu.trace_stop"() : () -> ()
    %c0_17 = arith.constant 0 : index
    %c0_18 = arith.constant 0 : index
    %c0_19 = arith.constant 0 : index
    %c0_20 = arith.constant 0 : index
    %37 = vector.load %arg6[%c0_17, %c0_18, %c0_19, %c0_20] : memref<2x4x1x24xf32, #tpu.memory_space<vmem>>, vector<1x4x1x24xf32>
    %38 = vector.shape_cast %37 : vector<1x4x1x24xf32> to vector<4x1x24xf32>
    %39 = vector.broadcast %38 : vector<4x1x24xf32> to vector<4x8x24xf32>
    %40 = arith.addf %36, %39 : vector<4x8x24xf32>
    %41 = vector.shape_cast %40 : vector<4x8x24xf32> to vector<4x1x8x24xf32>
    %42 = vector.shape_cast %41 : vector<4x1x8x24xf32> to vector<4x8x24xf32>
    %43 = vector.extract_strided_slice %42 {offsets = [0, 0, 0], sizes = [4, 8, 8], strides = [1, 1, 1]} : vector<4x8x24xf32> to vector<4x8x8xf32>
    %44 = arith.truncf %43 : vector<4x8x8xf32> to vector<4x8x8xbf16>
    %45 = vector.extract_strided_slice %42 {offsets = [0, 0, 8], sizes = [4, 8, 8], strides = [1, 1, 1]} : vector<4x8x24xf32> to vector<4x8x8xf32>
    %46 = arith.truncf %45 : vector<4x8x8xf32> to vector<4x8x8xbf16>
    %47 = vector.extract_strided_slice %42 {offsets = [0, 0, 16], sizes = [4, 8, 8], strides = [1, 1, 1]} : vector<4x8x24xf32> to vector<4x8x8xf32>
    %48 = arith.truncf %47 : vector<4x8x8xf32> to vector<4x8x8xbf16>
    "tpu.trace_start"() <{level = 10 : i32, message = "bqd,bkd->bqk"}> : () -> ()
    %cst_21 = arith.constant dense<0.000000e+00> : vector<4x8x8xf32>
    %49 = tpu.matmul %44, %46, %cst_21 {dimension_numbers = #tpu.dot_dimension_numbers<[2], [2], [1], [1], [0, 0, 0, 1, 1, 1], [0], [0]>} : vector<4x8x8xbf16>, vector<4x8x8xbf16>, vector<4x8x8xf32> -> vector<4x8x8xf32>
    "tpu.trace_stop"() : () -> ()
    %50 = vector.broadcast %4 : vector<4x1x8xf32> to vector<4x8x8xf32>
    %51 = arith.addf %49, %50 : vector<4x8x8xf32>
    %cst_22 = arith.constant dense<0xFF800000> : vector<4x8xf32>
    %52 = vector.multi_reduction <maximumf>, %51, %cst_22 [2] : vector<4x8x8xf32> to vector<4x8xf32>
    %53 = vector.shape_cast %52 : vector<4x8xf32> to vector<4x8x1xf32>
    %54 = vector.broadcast %53 : vector<4x8x1xf32> to vector<4x8x8xf32>
    %55 = arith.subf %51, %54 : vector<4x8x8xf32>
    %56 = math.exp %55 : vector<4x8x8xf32>
    %cst_23 = arith.constant dense<0.000000e+00> : vector<4x8xf32>
    %57 = vector.multi_reduction <add>, %56, %cst_23 [2] : vector<4x8x8xf32> to vector<4x8xf32>
    %58 = vector.shape_cast %57 : vector<4x8xf32> to vector<4x8x1xf32>
    %59 = tpu.reciprocal %58 {approx = true} : vector<4x8x1xf32> -> vector<4x8x1xf32>
    %60 = vector.broadcast %59 : vector<4x8x1xf32> to vector<4x8x8xf32>
    %61 = arith.mulf %56, %60 : vector<4x8x8xf32>
    %62 = arith.truncf %61 : vector<4x8x8xf32> to vector<4x8x8xbf16>
    "tpu.trace_start"() <{level = 10 : i32, message = "bqk,bkd->bqd"}> : () -> ()
    %cst_24 = arith.constant dense<0.000000e+00> : vector<4x8x8xf32>
    %63 = tpu.matmul %62, %48, %cst_24 {dimension_numbers = #tpu.dot_dimension_numbers<[2], [1], [1], [2], [0, 0, 0, 1, 1, 2], [0], [0]>} : vector<4x8x8xbf16>, vector<4x8x8xbf16>, vector<4x8x8xf32> -> vector<4x8x8xf32>
    "tpu.trace_stop"() : () -> ()
    %64 = vector.shape_cast %63 : vector<4x8x8xf32> to vector<4x1x8x8xf32>
    %65 = vector.shape_cast %64 : vector<4x1x8x8xf32> to vector<4x8x8xf32>
    %66 = arith.truncf %65 : vector<4x8x8xf32> to vector<4x8x8xbf16>
    %c0_25 = arith.constant 0 : index
    %c0_26 = arith.constant 0 : index
    %c0_27 = arith.constant 0 : index
    %c0_28 = arith.constant 0 : index
    %67 = vector.load %arg7[%c0_25, %c0_26, %c0_27, %c0_28] : memref<2x4x8x32xbf16, #tpu.memory_space<vmem>>, vector<1x4x8x32xbf16>
    %68 = vector.shape_cast %67 : vector<1x4x8x32xbf16> to vector<4x8x32xbf16>
    "tpu.trace_start"() <{level = 10 : i32, message = "hmd,hdn->hmn"}> : () -> ()
    %cst_29 = arith.constant dense<0.000000e+00> : vector<4x8x32xf32>
    %69 = tpu.matmul %66, %68, %cst_29 {dimension_numbers = #tpu.dot_dimension_numbers<[2], [1], [1], [2], [0, 0, 0, 1, 1, 2], [0], [0]>} : vector<4x8x8xbf16>, vector<4x8x32xbf16>, vector<4x8x32xf32> -> vector<4x8x32xf32>
    "tpu.trace_stop"() : () -> ()
    %cst_30 = arith.constant dense<0.000000e+00> : vector<8x32xf32>
    %70 = vector.multi_reduction <add>, %69, %cst_30 [0] : vector<4x8x32xf32> to vector<8x32xf32>
    %c0_31 = arith.constant 0 : index
    %c0_32 = arith.constant 0 : index
    %c0_33 = arith.constant 0 : index
    %71 = vector.load %arg8[%c0_31, %c0_32, %c0_33] : memref<2x1x32xf32, #tpu.memory_space<vmem>>, vector<1x1x32xf32>
    %72 = vector.shape_cast %71 : vector<1x1x32xf32> to vector<1x32xf32>
    %73 = vector.broadcast %72 : vector<1x32xf32> to vector<8x32xf32>
    %74 = arith.addf %70, %73 : vector<8x32xf32>
    %75 = arith.addf %74, %29 : vector<8x32xf32>
    %c0_34 = arith.constant 0 : index
    %c0_35 = arith.constant 0 : index
    %c0_36 = arith.constant 0 : index
    %76 = vector.load %arg9[%c0_34, %c0_35, %c0_36] : memref<2x1x32xf32, #tpu.memory_space<vmem>>, vector<1x1x32xf32>
    %77 = vector.shape_cast %76 : vector<1x1x32xf32> to vector<1x32xf32>
    %c0_37 = arith.constant 0 : index
    %c0_38 = arith.constant 0 : index
    %c0_39 = arith.constant 0 : index
    %78 = vector.load %arg10[%c0_37, %c0_38, %c0_39] : memref<2x1x32xf32, #tpu.memory_space<vmem>>, vector<1x1x32xf32>
    %79 = vector.shape_cast %78 : vector<1x1x32xf32> to vector<1x32xf32>
    %cst_40 = arith.constant dense<0.000000e+00> : vector<8xf32>
    %80 = vector.multi_reduction <add>, %75, %cst_40 [1] : vector<8x32xf32> to vector<8xf32>
    %81 = vector.shape_cast %80 : vector<8xf32> to vector<8x1xf32>
    %cst_41 = arith.constant 3.200000e+01 : f32
    %82 = vector.broadcast %cst_41 : f32 to vector<8x1xf32>
    %83 = arith.divf %81, %82 : vector<8x1xf32>
    %84 = vector.broadcast %83 : vector<8x1xf32> to vector<8x32xf32>
    %85 = arith.subf %75, %84 : vector<8x32xf32>
    %86 = arith.mulf %85, %85 : vector<8x32xf32>
    %cst_42 = arith.constant dense<0.000000e+00> : vector<8xf32>
    %87 = vector.multi_reduction <add>, %86, %cst_42 [1] : vector<8x32xf32> to vector<8xf32>
    %88 = vector.shape_cast %87 : vector<8xf32> to vector<8x1xf32>
    %cst_43 = arith.constant 3.200000e+01 : f32
    %89 = vector.broadcast %cst_43 : f32 to vector<8x1xf32>
    %90 = arith.divf %88, %89 : vector<8x1xf32>
    %91 = vector.broadcast %83 : vector<8x1xf32> to vector<8x32xf32>
    %92 = arith.subf %75, %91 : vector<8x32xf32>
    %cst_44 = arith.constant 9.99999996E-13 : f32
    %93 = vector.broadcast %cst_44 : f32 to vector<8x1xf32>
    %94 = arith.addf %90, %93 : vector<8x1xf32>
    %95 = math.rsqrt %94 : vector<8x1xf32>
    %96 = vector.broadcast %95 : vector<8x1xf32> to vector<8x32xf32>
    %97 = arith.mulf %92, %96 : vector<8x32xf32>
    %98 = vector.broadcast %77 : vector<1x32xf32> to vector<8x32xf32>
    %99 = arith.mulf %97, %98 : vector<8x32xf32>
    %100 = vector.broadcast %79 : vector<1x32xf32> to vector<8x32xf32>
    %101 = arith.addf %99, %100 : vector<8x32xf32>
    %c0_45 = arith.constant 0 : index
    %c0_46 = arith.constant 0 : index
    %c0_47 = arith.constant 0 : index
    %102 = vector.load %arg11[%c0_45, %c0_46, %c0_47] : memref<2x32x64xbf16, #tpu.memory_space<vmem>>, vector<1x32x64xbf16>
    %103 = vector.shape_cast %102 : vector<1x32x64xbf16> to vector<32x64xbf16>
    %104 = arith.truncf %101 : vector<8x32xf32> to vector<8x32xbf16>
    %cst_48 = arith.constant dense<0.000000e+00> : vector<8x64xf32>
    %105 = tpu.matmul %104, %103, %cst_48 {dimension_numbers = #tpu.dot_dimension_numbers<[1], [0], [0], [1], [0, 0, 1, 1], [], []>} : vector<8x32xbf16>, vector<32x64xbf16>, vector<8x64xf32> -> vector<8x64xf32>
    %c0_49 = arith.constant 0 : index
    %c0_50 = arith.constant 0 : index
    %c0_51 = arith.constant 0 : index
    %106 = vector.load %arg12[%c0_49, %c0_50, %c0_51] : memref<2x1x64xf32, #tpu.memory_space<vmem>>, vector<1x1x64xf32>
    %107 = vector.shape_cast %106 : vector<1x1x64xf32> to vector<1x64xf32>
    %108 = vector.broadcast %107 : vector<1x64xf32> to vector<8x64xf32>
    %109 = arith.addf %105, %108 : vector<8x64xf32>
    %cst_52 = arith.constant 5.000000e-01 : f32
    %110 = vector.broadcast %cst_52 : f32 to vector<8x64xf32>
    %111 = arith.mulf %110, %109 : vector<8x64xf32>
    %cst_53 = arith.constant 4.471500e-02 : f32
    %112 = vector.broadcast %cst_53 : f32 to vector<8x64xf32>
    %113 = arith.mulf %112, %109 : vector<8x64xf32>
    %114 = arith.mulf %113, %109 : vector<8x64xf32>
    %115 = arith.mulf %114, %109 : vector<8x64xf32>
    %116 = arith.addf %109, %115 : vector<8x64xf32>
    %cst_54 = arith.constant 0.797884583 : f32
    %117 = vector.broadcast %cst_54 : f32 to vector<8x64xf32>
    %118 = arith.mulf %117, %116 : vector<8x64xf32>
    %119 = math.tanh %118 : vector<8x64xf32>
    %cst_55 = arith.constant 1.000000e+00 : f32
    %120 = vector.broadcast %cst_55 : f32 to vector<8x64xf32>
    %121 = arith.addf %120, %119 : vector<8x64xf32>
    %122 = arith.mulf %111, %121 : vector<8x64xf32>
    %c0_56 = arith.constant 0 : index
    %c0_57 = arith.constant 0 : index
    %c0_58 = arith.constant 0 : index
    %123 = vector.load %arg13[%c0_56, %c0_57, %c0_58] : memref<2x64x32xbf16, #tpu.memory_space<vmem>>, vector<1x64x32xbf16>
    %124 = vector.shape_cast %123 : vector<1x64x32xbf16> to vector<64x32xbf16>
    %125 = arith.truncf %122 : vector<8x64xf32> to vector<8x64xbf16>
    %cst_59 = arith.constant dense<0.000000e+00> : vector<8x32xf32>
    %126 = tpu.matmul %125, %124, %cst_59 {dimension_numbers = #tpu.dot_dimension_numbers<[1], [0], [0], [1], [0, 0, 1, 1], [], []>} : vector<8x64xbf16>, vector<64x32xbf16>, vector<8x32xf32> -> vector<8x32xf32>
    %c0_60 = arith.constant 0 : index
    %c0_61 = arith.constant 0 : index
    %c0_62 = arith.constant 0 : index
    %127 = vector.load %arg14[%c0_60, %c0_61, %c0_62] : memref<2x1x32xf32, #tpu.memory_space<vmem>>, vector<1x1x32xf32>
    %128 = vector.shape_cast %127 : vector<1x1x32xf32> to vector<1x32xf32>
    %129 = vector.broadcast %128 : vector<1x32xf32> to vector<8x32xf32>
    %130 = arith.addf %126, %129 : vector<8x32xf32>
    %131 = arith.addf %130, %101 : vector<8x32xf32>
    %c0_63 = arith.constant 0 : index
    %c0_64 = arith.constant 0 : index
    %c0_65 = arith.constant 0 : index
    %132 = vector.load %arg15[%c0_63, %c0_64, %c0_65] : memref<2x1x32xf32, #tpu.memory_space<vmem>>, vector<1x1x32xf32>
    %133 = vector.shape_cast %132 : vector<1x1x32xf32> to vector<1x32xf32>
    %c0_66 = arith.constant 0 : index
    %c0_67 = arith.constant 0 : index
    %c0_68 = arith.constant 0 : index
    %134 = vector.load %arg16[%c0_66, %c0_67, %c0_68] : memref<2x1x32xf32, #tpu.memory_space<vmem>>, vector<1x1x32xf32>
    %135 = vector.shape_cast %134 : vector<1x1x32xf32> to vector<1x32xf32>
    %cst_69 = arith.constant dense<0.000000e+00> : vector<8xf32>
    %136 = vector.multi_reduction <add>, %131, %cst_69 [1] : vector<8x32xf32> to vector<8xf32>
    %137 = vector.shape_cast %136 : vector<8xf32> to vector<8x1xf32>
    %cst_70 = arith.constant 3.200000e+01 : f32
    %138 = vector.broadcast %cst_70 : f32 to vector<8x1xf32>
    %139 = arith.divf %137, %138 : vector<8x1xf32>
    %140 = vector.broadcast %139 : vector<8x1xf32> to vector<8x32xf32>
    %141 = arith.subf %131, %140 : vector<8x32xf32>
    %142 = arith.mulf %141, %141 : vector<8x32xf32>
    %cst_71 = arith.constant dense<0.000000e+00> : vector<8xf32>
    %143 = vector.multi_reduction <add>, %142, %cst_71 [1] : vector<8x32xf32> to vector<8xf32>
    %144 = vector.shape_cast %143 : vector<8xf32> to vector<8x1xf32>
    %cst_72 = arith.constant 3.200000e+01 : f32
    %145 = vector.broadcast %cst_72 : f32 to vector<8x1xf32>
    %146 = arith.divf %144, %145 : vector<8x1xf32>
    %147 = vector.broadcast %139 : vector<8x1xf32> to vector<8x32xf32>
    %148 = arith.subf %131, %147 : vector<8x32xf32>
    %cst_73 = arith.constant 9.99999996E-13 : f32
    %149 = vector.broadcast %cst_73 : f32 to vector<8x1xf32>
    %150 = arith.addf %146, %149 : vector<8x1xf32>
    %151 = math.rsqrt %150 : vector<8x1xf32>
    %152 = vector.broadcast %151 : vector<8x1xf32> to vector<8x32xf32>
    %153 = arith.mulf %148, %152 : vector<8x32xf32>
    %154 = vector.broadcast %133 : vector<1x32xf32> to vector<8x32xf32>
    %155 = arith.mulf %153, %154 : vector<8x32xf32>
    %156 = vector.broadcast %135 : vector<1x32xf32> to vector<8x32xf32>
    %157 = arith.addf %155, %156 : vector<8x32xf32>
    %158 = arith.truncf %157 : vector<8x32xf32> to vector<8x32xbf16>
    %159 = vector.shape_cast %158 : vector<8x32xbf16> to vector<1x8x32xbf16>
    %160 = vector.shape_cast %159 : vector<1x8x32xbf16> to vector<1x8x32xbf16>
    %161 = vector.broadcast %160 : vector<1x8x32xbf16> to vector<4x8x32xbf16>
    %c1 = arith.constant 1 : index
    %c0_74 = arith.constant 0 : index
    %c0_75 = arith.constant 0 : index
    %c0_76 = arith.constant 0 : index
    %162 = vector.load %arg5[%c1, %c0_74, %c0_75, %c0_76] : memref<2x4x32x24xbf16, #tpu.memory_space<vmem>>, vector<1x4x32x24xbf16>
    %163 = vector.shape_cast %162 : vector<1x4x32x24xbf16> to vector<4x32x24xbf16>
    "tpu.trace_start"() <{level = 10 : i32, message = "hmk,hkn->hmn"}> : () -> ()
    %cst_77 = arith.constant dense<0.000000e+00> : vector<4x8x24xf32>
    %164 = tpu.matmul %161, %163, %cst_77 {dimension_numbers = #tpu.dot_dimension_numbers<[2], [1], [1], [2], [0, 0, 0, 1, 1, 2], [0], [0]>} : vector<4x8x32xbf16>, vector<4x32x24xbf16>, vector<4x8x24xf32> -> vector<4x8x24xf32>
    "tpu.trace_stop"() : () -> ()
    %c1_78 = arith.constant 1 : index
    %c0_79 = arith.constant 0 : index
    %c0_80 = arith.constant 0 : index
    %c0_81 = arith.constant 0 : index
    %165 = vector.load %arg6[%c1_78, %c0_79, %c0_80, %c0_81] : memref<2x4x1x24xf32, #tpu.memory_space<vmem>>, vector<1x4x1x24xf32>
    %166 = vector.shape_cast %165 : vector<1x4x1x24xf32> to vector<4x1x24xf32>
    %167 = vector.broadcast %166 : vector<4x1x24xf32> to vector<4x8x24xf32>
    %168 = arith.addf %164, %167 : vector<4x8x24xf32>
    %169 = vector.shape_cast %168 : vector<4x8x24xf32> to vector<4x1x8x24xf32>
    %170 = vector.shape_cast %169 : vector<4x1x8x24xf32> to vector<4x8x24xf32>
    %171 = vector.extract_strided_slice %170 {offsets = [0, 0, 0], sizes = [4, 8, 8], strides = [1, 1, 1]} : vector<4x8x24xf32> to vector<4x8x8xf32>
    %172 = arith.truncf %171 : vector<4x8x8xf32> to vector<4x8x8xbf16>
    %173 = vector.extract_strided_slice %170 {offsets = [0, 0, 8], sizes = [4, 8, 8], strides = [1, 1, 1]} : vector<4x8x24xf32> to vector<4x8x8xf32>
    %174 = arith.truncf %173 : vector<4x8x8xf32> to vector<4x8x8xbf16>
    %175 = vector.extract_strided_slice %170 {offsets = [0, 0, 16], sizes = [4, 8, 8], strides = [1, 1, 1]} : vector<4x8x24xf32> to vector<4x8x8xf32>
    %176 = arith.truncf %175 : vector<4x8x8xf32> to vector<4x8x8xbf16>
    "tpu.trace_start"() <{level = 10 : i32, message = "bqd,bkd->bqk"}> : () -> ()
    %cst_82 = arith.constant dense<0.000000e+00> : vector<4x8x8xf32>
    %177 = tpu.matmul %172, %174, %cst_82 {dimension_numbers = #tpu.dot_dimension_numbers<[2], [2], [1], [1], [0, 0, 0, 1, 1, 1], [0], [0]>} : vector<4x8x8xbf16>, vector<4x8x8xbf16>, vector<4x8x8xf32> -> vector<4x8x8xf32>
    "tpu.trace_stop"() : () -> ()
    %178 = vector.broadcast %4 : vector<4x1x8xf32> to vector<4x8x8xf32>
    %179 = arith.addf %177, %178 : vector<4x8x8xf32>
    %cst_83 = arith.constant dense<0xFF800000> : vector<4x8xf32>
    %180 = vector.multi_reduction <maximumf>, %179, %cst_83 [2] : vector<4x8x8xf32> to vector<4x8xf32>
    %181 = vector.shape_cast %180 : vector<4x8xf32> to vector<4x8x1xf32>
    %182 = vector.broadcast %181 : vector<4x8x1xf32> to vector<4x8x8xf32>
    %183 = arith.subf %179, %182 : vector<4x8x8xf32>
    %184 = math.exp %183 : vector<4x8x8xf32>
    %cst_84 = arith.constant dense<0.000000e+00> : vector<4x8xf32>
    %185 = vector.multi_reduction <add>, %184, %cst_84 [2] : vector<4x8x8xf32> to vector<4x8xf32>
    %186 = vector.shape_cast %185 : vector<4x8xf32> to vector<4x8x1xf32>
    %187 = tpu.reciprocal %186 {approx = true} : vector<4x8x1xf32> -> vector<4x8x1xf32>
    %188 = vector.broadcast %187 : vector<4x8x1xf32> to vector<4x8x8xf32>
    %189 = arith.mulf %184, %188 : vector<4x8x8xf32>
    %190 = arith.truncf %189 : vector<4x8x8xf32> to vector<4x8x8xbf16>
    "tpu.trace_start"() <{level = 10 : i32, message = "bqk,bkd->bqd"}> : () -> ()
    %cst_85 = arith.constant dense<0.000000e+00> : vector<4x8x8xf32>
    %191 = tpu.matmul %190, %176, %cst_85 {dimension_numbers = #tpu.dot_dimension_numbers<[2], [1], [1], [2], [0, 0, 0, 1, 1, 2], [0], [0]>} : vector<4x8x8xbf16>, vector<4x8x8xbf16>, vector<4x8x8xf32> -> vector<4x8x8xf32>
    "tpu.trace_stop"() : () -> ()
    %192 = vector.shape_cast %191 : vector<4x8x8xf32> to vector<4x1x8x8xf32>
    %193 = vector.shape_cast %192 : vector<4x1x8x8xf32> to vector<4x8x8xf32>
    %194 = arith.truncf %193 : vector<4x8x8xf32> to vector<4x8x8xbf16>
    %c1_86 = arith.constant 1 : index
    %c0_87 = arith.constant 0 : index
    %c0_88 = arith.constant 0 : index
    %c0_89 = arith.constant 0 : index
    %195 = vector.load %arg7[%c1_86, %c0_87, %c0_88, %c0_89] : memref<2x4x8x32xbf16, #tpu.memory_space<vmem>>, vector<1x4x8x32xbf16>
    %196 = vector.shape_cast %195 : vector<1x4x8x32xbf16> to vector<4x8x32xbf16>
    "tpu.trace_start"() <{level = 10 : i32, message = "hmd,hdn->hmn"}> : () -> ()
    %cst_90 = arith.constant dense<0.000000e+00> : vector<4x8x32xf32>
    %197 = tpu.matmul %194, %196, %cst_90 {dimension_numbers = #tpu.dot_dimension_numbers<[2], [1], [1], [2], [0, 0, 0, 1, 1, 2], [0], [0]>} : vector<4x8x8xbf16>, vector<4x8x32xbf16>, vector<4x8x32xf32> -> vector<4x8x32xf32>
    "tpu.trace_stop"() : () -> ()
    %cst_91 = arith.constant dense<0.000000e+00> : vector<8x32xf32>
    %198 = vector.multi_reduction <add>, %197, %cst_91 [0] : vector<4x8x32xf32> to vector<8x32xf32>
    %c1_92 = arith.constant 1 : index
    %c0_93 = arith.constant 0 : index
    %c0_94 = arith.constant 0 : index
    %199 = vector.load %arg8[%c1_92, %c0_93, %c0_94] : memref<2x1x32xf32, #tpu.memory_space<vmem>>, vector<1x1x32xf32>
    %200 = vector.shape_cast %199 : vector<1x1x32xf32> to vector<1x32xf32>
    %201 = vector.broadcast %200 : vector<1x32xf32> to vector<8x32xf32>
    %202 = arith.addf %198, %201 : vector<8x32xf32>
    %203 = arith.addf %202, %157 : vector<8x32xf32>
    %c1_95 = arith.constant 1 : index
    %c0_96 = arith.constant 0 : index
    %c0_97 = arith.constant 0 : index
    %204 = vector.load %arg9[%c1_95, %c0_96, %c0_97] : memref<2x1x32xf32, #tpu.memory_space<vmem>>, vector<1x1x32xf32>
    %205 = vector.shape_cast %204 : vector<1x1x32xf32> to vector<1x32xf32>
    %c1_98 = arith.constant 1 : index
    %c0_99 = arith.constant 0 : index
    %c0_100 = arith.constant 0 : index
    %206 = vector.load %arg10[%c1_98, %c0_99, %c0_100] : memref<2x1x32xf32, #tpu.memory_space<vmem>>, vector<1x1x32xf32>
    %207 = vector.shape_cast %206 : vector<1x1x32xf32> to vector<1x32xf32>
    %cst_101 = arith.constant dense<0.000000e+00> : vector<8xf32>
    %208 = vector.multi_reduction <add>, %203, %cst_101 [1] : vector<8x32xf32> to vector<8xf32>
    %209 = vector.shape_cast %208 : vector<8xf32> to vector<8x1xf32>
    %cst_102 = arith.constant 3.200000e+01 : f32
    %210 = vector.broadcast %cst_102 : f32 to vector<8x1xf32>
    %211 = arith.divf %209, %210 : vector<8x1xf32>
    %212 = vector.broadcast %211 : vector<8x1xf32> to vector<8x32xf32>
    %213 = arith.subf %203, %212 : vector<8x32xf32>
    %214 = arith.mulf %213, %213 : vector<8x32xf32>
    %cst_103 = arith.constant dense<0.000000e+00> : vector<8xf32>
    %215 = vector.multi_reduction <add>, %214, %cst_103 [1] : vector<8x32xf32> to vector<8xf32>
    %216 = vector.shape_cast %215 : vector<8xf32> to vector<8x1xf32>
    %cst_104 = arith.constant 3.200000e+01 : f32
    %217 = vector.broadcast %cst_104 : f32 to vector<8x1xf32>
    %218 = arith.divf %216, %217 : vector<8x1xf32>
    %219 = vector.broadcast %211 : vector<8x1xf32> to vector<8x32xf32>
    %220 = arith.subf %203, %219 : vector<8x32xf32>
    %cst_105 = arith.constant 9.99999996E-13 : f32
    %221 = vector.broadcast %cst_105 : f32 to vector<8x1xf32>
    %222 = arith.addf %218, %221 : vector<8x1xf32>
    %223 = math.rsqrt %222 : vector<8x1xf32>
    %224 = vector.broadcast %223 : vector<8x1xf32> to vector<8x32xf32>
    %225 = arith.mulf %220, %224 : vector<8x32xf32>
    %226 = vector.broadcast %205 : vector<1x32xf32> to vector<8x32xf32>
    %227 = arith.mulf %225, %226 : vector<8x32xf32>
    %228 = vector.broadcast %207 : vector<1x32xf32> to vector<8x32xf32>
    %229 = arith.addf %227, %228 : vector<8x32xf32>
    %c1_106 = arith.constant 1 : index
    %c0_107 = arith.constant 0 : index
    %c0_108 = arith.constant 0 : index
    %230 = vector.load %arg11[%c1_106, %c0_107, %c0_108] : memref<2x32x64xbf16, #tpu.memory_space<vmem>>, vector<1x32x64xbf16>
    %231 = vector.shape_cast %230 : vector<1x32x64xbf16> to vector<32x64xbf16>
    %232 = arith.truncf %229 : vector<8x32xf32> to vector<8x32xbf16>
    %cst_109 = arith.constant dense<0.000000e+00> : vector<8x64xf32>
    %233 = tpu.matmul %232, %231, %cst_109 {dimension_numbers = #tpu.dot_dimension_numbers<[1], [0], [0], [1], [0, 0, 1, 1], [], []>} : vector<8x32xbf16>, vector<32x64xbf16>, vector<8x64xf32> -> vector<8x64xf32>
    %c1_110 = arith.constant 1 : index
    %c0_111 = arith.constant 0 : index
    %c0_112 = arith.constant 0 : index
    %234 = vector.load %arg12[%c1_110, %c0_111, %c0_112] : memref<2x1x64xf32, #tpu.memory_space<vmem>>, vector<1x1x64xf32>
    %235 = vector.shape_cast %234 : vector<1x1x64xf32> to vector<1x64xf32>
    %236 = vector.broadcast %235 : vector<1x64xf32> to vector<8x64xf32>
    %237 = arith.addf %233, %236 : vector<8x64xf32>
    %cst_113 = arith.constant 5.000000e-01 : f32
    %238 = vector.broadcast %cst_113 : f32 to vector<8x64xf32>
    %239 = arith.mulf %238, %237 : vector<8x64xf32>
    %cst_114 = arith.constant 4.471500e-02 : f32
    %240 = vector.broadcast %cst_114 : f32 to vector<8x64xf32>
    %241 = arith.mulf %240, %237 : vector<8x64xf32>
    %242 = arith.mulf %241, %237 : vector<8x64xf32>
    %243 = arith.mulf %242, %237 : vector<8x64xf32>
    %244 = arith.addf %237, %243 : vector<8x64xf32>
    %cst_115 = arith.constant 0.797884583 : f32
    %245 = vector.broadcast %cst_115 : f32 to vector<8x64xf32>
    %246 = arith.mulf %245, %244 : vector<8x64xf32>
    %247 = math.tanh %246 : vector<8x64xf32>
    %cst_116 = arith.constant 1.000000e+00 : f32
    %248 = vector.broadcast %cst_116 : f32 to vector<8x64xf32>
    %249 = arith.addf %248, %247 : vector<8x64xf32>
    %250 = arith.mulf %239, %249 : vector<8x64xf32>
    %c1_117 = arith.constant 1 : index
    %c0_118 = arith.constant 0 : index
    %c0_119 = arith.constant 0 : index
    %251 = vector.load %arg13[%c1_117, %c0_118, %c0_119] : memref<2x64x32xbf16, #tpu.memory_space<vmem>>, vector<1x64x32xbf16>
    %252 = vector.shape_cast %251 : vector<1x64x32xbf16> to vector<64x32xbf16>
    %253 = arith.truncf %250 : vector<8x64xf32> to vector<8x64xbf16>
    %cst_120 = arith.constant dense<0.000000e+00> : vector<8x32xf32>
    %254 = tpu.matmul %253, %252, %cst_120 {dimension_numbers = #tpu.dot_dimension_numbers<[1], [0], [0], [1], [0, 0, 1, 1], [], []>} : vector<8x64xbf16>, vector<64x32xbf16>, vector<8x32xf32> -> vector<8x32xf32>
    %c1_121 = arith.constant 1 : index
    %c0_122 = arith.constant 0 : index
    %c0_123 = arith.constant 0 : index
    %255 = vector.load %arg14[%c1_121, %c0_122, %c0_123] : memref<2x1x32xf32, #tpu.memory_space<vmem>>, vector<1x1x32xf32>
    %256 = vector.shape_cast %255 : vector<1x1x32xf32> to vector<1x32xf32>
    %257 = vector.broadcast %256 : vector<1x32xf32> to vector<8x32xf32>
    %258 = arith.addf %254, %257 : vector<8x32xf32>
    %259 = arith.addf %258, %229 : vector<8x32xf32>
    %c1_124 = arith.constant 1 : index
    %c0_125 = arith.constant 0 : index
    %c0_126 = arith.constant 0 : index
    %260 = vector.load %arg15[%c1_124, %c0_125, %c0_126] : memref<2x1x32xf32, #tpu.memory_space<vmem>>, vector<1x1x32xf32>
    %261 = vector.shape_cast %260 : vector<1x1x32xf32> to vector<1x32xf32>
    %c1_127 = arith.constant 1 : index
    %c0_128 = arith.constant 0 : index
    %c0_129 = arith.constant 0 : index
    %262 = vector.load %arg16[%c1_127, %c0_128, %c0_129] : memref<2x1x32xf32, #tpu.memory_space<vmem>>, vector<1x1x32xf32>
    %263 = vector.shape_cast %262 : vector<1x1x32xf32> to vector<1x32xf32>
    %cst_130 = arith.constant dense<0.000000e+00> : vector<8xf32>
    %264 = vector.multi_reduction <add>, %259, %cst_130 [1] : vector<8x32xf32> to vector<8xf32>
    %265 = vector.shape_cast %264 : vector<8xf32> to vector<8x1xf32>
    %cst_131 = arith.constant 3.200000e+01 : f32
    %266 = vector.broadcast %cst_131 : f32 to vector<8x1xf32>
    %267 = arith.divf %265, %266 : vector<8x1xf32>
    %268 = vector.broadcast %267 : vector<8x1xf32> to vector<8x32xf32>
    %269 = arith.subf %259, %268 : vector<8x32xf32>
    %270 = arith.mulf %269, %269 : vector<8x32xf32>
    %cst_132 = arith.constant dense<0.000000e+00> : vector<8xf32>
    %271 = vector.multi_reduction <add>, %270, %cst_132 [1] : vector<8x32xf32> to vector<8xf32>
    %272 = vector.shape_cast %271 : vector<8xf32> to vector<8x1xf32>
    %cst_133 = arith.constant 3.200000e+01 : f32
    %273 = vector.broadcast %cst_133 : f32 to vector<8x1xf32>
    %274 = arith.divf %272, %273 : vector<8x1xf32>
    %275 = vector.broadcast %267 : vector<8x1xf32> to vector<8x32xf32>
    %276 = arith.subf %259, %275 : vector<8x32xf32>
    %cst_134 = arith.constant 9.99999996E-13 : f32
    %277 = vector.broadcast %cst_134 : f32 to vector<8x1xf32>
    %278 = arith.addf %274, %277 : vector<8x1xf32>
    %279 = math.rsqrt %278 : vector<8x1xf32>
    %280 = vector.broadcast %279 : vector<8x1xf32> to vector<8x32xf32>
    %281 = arith.mulf %276, %280 : vector<8x32xf32>
    %282 = vector.broadcast %261 : vector<1x32xf32> to vector<8x32xf32>
    %283 = arith.mulf %281, %282 : vector<8x32xf32>
    %284 = vector.broadcast %263 : vector<1x32xf32> to vector<8x32xf32>
    %285 = arith.addf %283, %284 : vector<8x32xf32>
    %c0_135 = arith.constant 0 : index
    %c0_136 = arith.constant 0 : index
    %286 = vector.load %arg17[%c0_135, %c0_136] : memref<32x32xbf16, #tpu.memory_space<vmem>>, vector<32x32xbf16>
    %287 = arith.truncf %285 : vector<8x32xf32> to vector<8x32xbf16>
    %cst_137 = arith.constant dense<0.000000e+00> : vector<8x32xf32>
    %288 = tpu.matmul %287, %286, %cst_137 {dimension_numbers = #tpu.dot_dimension_numbers<[1], [0], [0], [1], [0, 0, 1, 1], [], []>} : vector<8x32xbf16>, vector<32x32xbf16>, vector<8x32xf32> -> vector<8x32xf32>
    %c0_138 = arith.constant 0 : index
    %c0_139 = arith.constant 0 : index
    %289 = vector.load %arg18[%c0_138, %c0_139] : memref<1x32xf32, #tpu.memory_space<vmem>>, vector<1x32xf32>
    %290 = vector.broadcast %289 : vector<1x32xf32> to vector<8x32xf32>
    %291 = arith.addf %288, %290 : vector<8x32xf32>
    %292 = math.tanh %291 : vector<8x32xf32>
    %c0_140 = arith.constant 0 : index
    %c0_141 = arith.constant 0 : index
    %293 = vector.load %arg19[%c0_140, %c0_141] : memref<32x128xbf16, #tpu.memory_space<vmem>>, vector<32x128xbf16>
    %294 = arith.truncf %292 : vector<8x32xf32> to vector<8x32xbf16>
    %cst_142 = arith.constant dense<0.000000e+00> : vector<8x128xf32>
    %295 = tpu.matmul %294, %293, %cst_142 {dimension_numbers = #tpu.dot_dimension_numbers<[1], [0], [0], [1], [0, 0, 1, 1], [], []>} : vector<8x32xbf16>, vector<32x128xbf16>, vector<8x128xf32> -> vector<8x128xf32>
    %c0_143 = arith.constant 0 : index
    %c0_144 = arith.constant 0 : index
    %296 = vector.load %arg20[%c0_143, %c0_144] : memref<1x128xf32, #tpu.memory_space<vmem>>, vector<1x128xf32>
    %297 = vector.broadcast %296 : vector<1x128xf32> to vector<8x128xf32>
    %298 = arith.addf %295, %297 : vector<8x128xf32>
    %c0_145 = arith.constant 0 : index
    %c0_146 = arith.constant 0 : index
    %299 = vector.load %arg21[%c0_145, %c0_146] : memref<8x128xf32, #tpu.memory_space<vmem>>, vector<8x128xf32>
    tpu.vector_store %arg21[%c0_145, %c0_146], %298 {strides = array<i32>} : memref<8x128xf32, #tpu.memory_space<vmem>>, vector<8x128xf32>,
    return
  }
  func.func @transform_0(%arg0: i32) -> (i32, i32) {
    %c0_i32 = arith.constant 0 : i32
    %c0_i32_0 = arith.constant 0 : i32
    return %arg0, %c0_i32 : i32, i32
  }
  func.func @transform_1(%arg0: i32) -> (i32, i32, i32) {
    %c0_i32 = arith.constant 0 : i32
    %c0_i32_0 = arith.constant 0 : i32
    %c0_i32_1 = arith.constant 0 : i32
    return %arg0, %c0_i32, %c0_i32_0 : i32, i32, i32
  }
  func.func @transform_2(%arg0: i32) -> (i32, i32) {
    %c0_i32 = arith.constant 0 : i32
    %c0_i32_0 = arith.constant 0 : i32
    %c0_i32_1 = arith.constant 0 : i32
    return %c0_i32, %c0_i32_0 : i32, i32
  }
  func.func @transform_3(%arg0: i32) -> (i32, i32) {
    %c0_i32 = arith.constant 0 : i32
    %c0_i32_0 = arith.constant 0 : i32
    %c0_i32_1 = arith.constant 0 : i32
    return %c0_i32, %c0_i32_0 : i32, i32
  }
  func.func @transform_4(%arg0: i32) -> (i32, i32, i32, i32) {
    %c0_i32 = arith.constant 0 : i32
    %c0_i32_0 = arith.constant 0 : i32
    %c0_i32_1 = arith.constant 0 : i32
    %c0_i32_2 = arith.constant 0 : i32
    %c0_i32_3 = arith.constant 0 : i32
    return %c0_i32, %c0_i32_0, %c0_i32_1, %c0_i32_2 : i32, i32, i32, i32
  }
  func.func @transform_5(%arg0: i32) -> (i32, i32, i32, i32) {
    %c0_i32 = arith.constant 0 : i32
    %c0_i32_0 = arith.constant 0 : i32
    %c0_i32_1 = arith.constant 0 : i32
    %c0_i32_2 = arith.constant 0 : i32
    %c0_i32_3 = arith.constant 0 : i32
    return %c0_i32, %c0_i32_0, %c0_i32_1, %c0_i32_2 : i32, i32, i32, i32
  }
  func.func @transform_6(%arg0: i32) -> (i32, i32, i32, i32) {
    %c0_i32 = arith.constant 0 : i32
    %c0_i32_0 = arith.constant 0 : i32
    %c0_i32_1 = arith.constant 0 : i32
    %c0_i32_2 = arith.constant 0 : i32
    %c0_i32_3 = arith.constant 0 : i32
    return %c0_i32, %c0_i32_0, %c0_i32_1, %c0_i32_2 : i32, i32, i32, i32
  }
  func.func @transform_7(%arg0: i32) -> (i32, i32, i32) {
    %c0_i32 = arith.constant 0 : i32
    %c0_i32_0 = arith.constant 0 : i32
    %c0_i32_1 = arith.constant 0 : i32
    %c0_i32_2 = arith.constant 0 : i32
    return %c0_i32, %c0_i32_0, %c0_i32_1 : i32, i32, i32
  }
  func.func @transform_8(%arg0: i32) -> (i32, i32, i32) {
    %c0_i32 = arith.constant 0 : i32
    %c0_i32_0 = arith.constant 0 : i32
    %c0_i32_1 = arith.constant 0 : i32
    %c0_i32_2 = arith.constant 0 : i32
    return %c0_i32, %c0_i32_0, %c0_i32_1 : i32, i32, i32
  }
  func.func @transform_9(%arg0: i32) -> (i32, i32, i32) {
    %c0_i32 = arith.constant 0 : i32
    %c0_i32_0 = arith.constant 0 : i32
    %c0_i32_1 = arith.constant 0 : i32
    %c0_i32_2 = arith.constant 0 : i32
    return %c0_i32, %c0_i32_0, %c0_i32_1 : i32, i32, i32
  }
  func.func @transform_10(%arg0: i32) -> (i32, i32, i32) {
    %c0_i32 = arith.constant 0 : i32
    %c0_i32_0 = arith.constant 0 : i32
    %c0_i32_1 = arith.constant 0 : i32
    %c0_i32_2 = arith.constant 0 : i32
    return %c0_i32, %c0_i32_0, %c0_i32_1 : i32, i32, i32
  }
  func.func @transform_11(%arg0: i32) -> (i32, i32, i32) {
    %c0_i32 = arith.constant 0 : i32
    %c0_i32_0 = arith.constant 0 : i32
    %c0_i32_1 = arith.constant 0 : i32
    %c0_i32_2 = arith.constant 0 : i32
    return %c0_i32, %c0_i32_0, %c0_i32_1 : i32, i32, i32
  }
  func.func @transform_12(%arg0: i32) -> (i32, i32, i32) {
    %c0_i32 = arith.constant 0 : i32
    %c0_i32_0 = arith.constant 0 : i32
    %c0_i32_1 = arith.constant 0 : i32
    %c0_i32_2 = arith.constant 0 : i32
    return %c0_i32, %c0_i32_0, %c0_i32_1 : i32, i32, i32
  }
  func.func @transform_13(%arg0: i32) -> (i32, i32, i32) {
    %c0_i32 = arith.constant 0 : i32
    %c0_i32_0 = arith.constant 0 : i32
    %c0_i32_1 = arith.constant 0 : i32
    %c0_i32_2 = arith.constant 0 : i32
    return %c0_i32, %c0_i32_0, %c0_i32_1 : i32, i32, i32
  }
  func.func @transform_14(%arg0: i32) -> (i32, i32, i32) {
    %c0_i32 = arith.constant 0 : i32
    %c0_i32_0 = arith.constant 0 : i32
    %c0_i32_1 = arith.constant 0 : i32
    %c0_i32_2 = arith.constant 0 : i32
    return %c0_i32, %c0_i32_0, %c0_i32_1 : i32, i32, i32
  }
  func.func @transform_15(%arg0: i32) -> (i32, i32, i32) {
    %c0_i32 = arith.constant 0 : i32
    %c0_i32_0 = arith.constant 0 : i32
    %c0_i32_1 = arith.constant 0 : i32
    %c0_i32_2 = arith.constant 0 : i32
    return %c0_i32, %c0_i32_0, %c0_i32_1 : i32, i32, i32
  }
  func.func @transform_16(%arg0: i32) -> (i32, i32) {
    %c0_i32 = arith.constant 0 : i32
    %c0_i32_0 = arith.constant 0 : i32
    %c0_i32_1 = arith.constant 0 : i32
    return %c0_i32, %c0_i32_0 : i32, i32
  }
  func.func @transform_17(%arg0: i32) -> (i32, i32) {
    %c0_i32 = arith.constant 0 : i32
    %c0_i32_0 = arith.constant 0 : i32
    %c0_i32_1 = arith.constant 0 : i32
    return %c0_i32, %c0_i32_0 : i32, i32
  }
  func.func @transform_18(%arg0: i32) -> (i32, i32) {
    %c0_i32 = arith.constant 0 : i32
    %c0_i32_0 = arith.constant 0 : i32
    %c0_i32_1 = arith.constant 0 : i32
    return %c0_i32, %c0_i32_0 : i32, i32
  }
  func.func @transform_19(%arg0: i32) -> (i32, i32) {
    %c0_i32 = arith.constant 0 : i32
    %c0_i32_0 = arith.constant 0 : i32
    %c0_i32_1 = arith.constant 0 : i32
    return %c0_i32, %c0_i32_0 : i32, i32
  }
  func.func @transform_20(%arg0: i32) -> (i32, i32) {
    %c0_i32 = arith.constant 0 : i32
    %c0_i32_0 = arith.constant 0 : i32
    return %arg0, %c0_i32 : i32, i32
  }
}

</mosaic_0001>

<bundles_post_ra>
// kernel: sentiment_classifier_forward.1
= control target key start
LH: loop header
LB: loop body
LE: loop exit
PB: predicated region body
PF: predicated region fallthrough
CT: control target
= control target key end

     0   :  { %s4382_s0 = inlined_call_operand.vmem [shape: f32[16,32], index: 0, kind: input, shape index: {}]   ;;  %s4383_s1 = inlined_call_operand.vmem [shape: f32[2,1,8], index: 1, kind: input, shape index: {}]   ;;  %s4384_s2 = inlined_call_operand.vmem [shape: f32[1,32], index: 2, kind: input, shape index: {}]   ;;  %s4385_s3 = inlined_call_operand.vmem [shape: f32[1,32], index: 3, kind: input, shape index: {}]   ;;  %s4386_s4 = inlined_call_operand.vmem [shape: bf16[2,4,32,24], index: 4, kind: input, shape index: {}]   ;;  %s4387_s5 = inlined_call_operand.vmem [shape: f32[2,4,1,24], index: 5, kind: input, shape index: {}]   ;;  %s4388_s6 = inlined_call_operand.vmem [shape: bf16[2,4,8,32], index: 6, kind: input, shape index: {}]   ;;  %s4389_s7 = inlined_call_operand.vmem [shape: f32[2,1,32], index: 7, kind: input, shape index: {}]   ;;  %s4390_s8 = inlined_call_operand.vmem [shape: f32[2,1,32], index: 8, kind: input, shape index: {}]   ;;  %s4391_s9 = inlined_call_operand.vmem [shape: f32[2,1,32], index: 9, kind: input, shape index: {}]   ;;  %s4392_s10 = inlined_call_operand.vmem [shape: bf16[2,32,64], index: 10, kind: input, shape index: {}]   ;;  %s4393_s11 = inlined_call_operand.vmem [shape: f32[2,1,64], index: 11, kind: input, shape index: {}]   ;;  %s4394_s12 = inlined_call_operand.vmem [shape: bf16[2,64,32], index: 12, kind: input, shape index: {}]   ;;  %s4395_s13 = inlined_call_operand.vmem [shape: f32[2,1,32], index: 13, kind: input, shape index: {}]   ;;  %s4396_s14 = inlined_call_operand.vmem [shape: f32[2,1,32], index: 14, kind: input, shape index: {}]   ;;  %s4397_s15 = inlined_call_operand.vmem [shape: f32[2,1,32], index: 15, kind: input, shape index: {}]   ;;  %s4398_s16 = inlined_call_operand.vmem [shape: bf16[32,32], index: 16, kind: input, shape index: {}]   ;;  %s4399_s17 = inlined_call_operand.vmem [shape: f32[1,32], index: 17, kind: input, shape index: {}]   ;;  %s4400_s18 = inlined_call_operand.vmem [shape: bf16[32,128], index: 18, kind: input, shape index: {}]   ;;  %s4401_s19 = inlined_call_operand.vmem [shape: f32[1,128], index: 19, kind: input, shape index: {}]   ;;  %s4402_s20 = inlined_call_operand.vmem [shape: f32[16,128], index: 20, kind: output, shape index: {}]  }
   0x1   :  { %4404 = sst [smem:[#allocation2_spill]] %s4382_s0 }
   0x2   :  { %4405 = sst [smem:[#allocation3_spill]] %s4383_s1  ;;  %s3852_s1 = smov 0  }
   0x3   :  { %4406 = sst [smem:[#allocation4_spill]] %s4384_s2 }
   0x4   :  { %4407 = sst [smem:[#allocation5_spill]] %s4385_s3 }
   0x5   :  { %4408 = sst [smem:[#allocation6_spill]] %s4386_s4 }
   0x6 LB: > { %s3136_s22 = sadd.s32 4294967295, %s3741_s1   ;;  %p3140_p0 = scmp.ge.s32.totalorder %s3741_s1, 1  ;;  %s3741_s1 = sphi %s3852_s1, %s30_s1  }
   0x7   : > { %p569_p1 = scmp.lt.s32.totalorder %s3741_s1, 3 }
   0x9   : > { %p570_p2 = pnand %p3140_p0, %p569_p1 }
   0xa   : > { %p628_p3 = scmp.lt.s32.totalorder (!%p570_p2), %s3136_s22, 1  ;;  %vm644_vm0 = vcmask (!%p570_p2), 261120   ;;  %s4409_s25 = sld [smem:[#allocation2_spill]] (!%p570_p2)  ;;  %v3743_v9 = vmov (!%p570_p2), 0.0   ;;  %vm3744_vm1 = vmmov (!%p570_p2), 0   ;;  %vm942_vm2 = vcmask (!%p570_p2), 64512  }
   0xb   : > { %573 = sbr.rel (%p570_p2) target bundleno = 5585 (0x15d1), region = 100  ;;  %s4410_s28 = sld [smem:[#allocation6_spill]] (!%p570_p2)  ;;  %3379 = vmatprep.subr.bf16.mxu0 (!%p570_p2), %v3743_v9  ;;  %3387 = vmatprep.subr.bf16.mxu1 (!%p570_p2), %v3743_v9  ;;  %v3145_v26 = vld [vmem:[%s4387_s5] ss:$0 sm:$0xff] (!%p570_p2)  ;;  %v3146_v28 = vld [vmem:[%s4387_s5 + $0x1] ss:$0 sm:$0xff] (!%p570_p2) }
   0xc   : > { %3383 = vmatprep.mubr.msk.bf16.mxu0 (!%p570_p2), %vm3744_vm1, %v3743_v9  ;;  %3391 = vmatprep.mubr.msk.bf16.mxu1 (!%p570_p2), %vm3744_vm1, %v3743_v9  ;;  %s4412_s4 = sld [smem:[#allocation5_spill]] (!%p570_p2)  ;;  %s3745_s30 = smov (!%p570_p2), 120   ;;  %v3147_v39 = vld [vmem:[%s4387_s5 + $0x2] ss:$0 sm:$0xff] (!%p570_p2)  ;;  %v3148_v40 = vld [vmem:[%s4387_s5 + $0x3] ss:$0 sm:$0xff] (!%p570_p2) }
   0xd   : > { %s4413_s26 = sld [smem:[#allocation3_spill]] (!%p570_p2)  ;;  %vm1189_vm3 = vcmask (!%p570_p2), 1043456   ;;  %vm1730_vm4 = vcmask (!%p570_p2), 523264  }
  0x11   : > { %v3655_v7 = vld [vmem:[%s4410_s28] sm:$0xff] (!%p570_p2)   ;;  %v3656_v8 = vld [vmem:[%s4410_s28 + $0x10] sm:$0xff] (!%p570_p2)   ;;  %v3657_v10 = vld [vmem:[%s4410_s28 + $0x8] sm:$0xff] (!%p570_p2)  }
  0x12   : > { %s4415_s22 = smov (!%p628_p3, %s3136_s22), 1  ;;  %3380 = vmatpush3.bf16.msra.mxu0 %v3655_v7  ;;  %3388 = vmatpush3.bf16.msra.mxu1 %v3656_v8  ;;  %v3658_v11 = vld [vmem:[%s4410_s28 + $0x18] sm:$0xff]   ;;  %v3144_v18 = vld [vmem:[%s4412_s4] ss:$0 sm:$0xff]  ;;  %v3660_v22 = vld [vmem:[%s4410_s28 + $0x30] sm:$0xff]   ;;  %s3746_s4 = smov 112  }
  0x13   : > { %s3141_s23 = sshll.u32 %s4415_s22, 3  ;;  %3381 = vmatprep.subr.bf16.mxu0 %v3743_v9  ;;  %3389 = vmatprep.subr.bf16.mxu1 %v3743_v9  ;;  %v3659_v21 = vld [vmem:[%s4410_s28 + $0x20] sm:$0xff]   ;;  %v3661_v24 = vld [vmem:[%s4410_s28 + $0x28] sm:$0xff]   ;;  %v3662_v25 = vld [vmem:[%s4410_s28 + $0x38] sm:$0xff]   ;;  %s634_s27 = scalar_lea.vmem %s4413_s26, %s4415_s22 }
  0x14   : > { %s631_s3 = scalar_lea.vmem %s4409_s25, %s3141_s23  ;;  %v3986_v62 = vld [vmem:[%s634_s27] ss:$0 sm:$0xff] }
  0x15   : > { %v641_v0 = vld [vmem:[%s631_s3] sm:$0xff]  ;;  %s4411_s3 = sld [smem:[#allocation4_spill]] }
  0x16   : > { %v645_v1 = vsel %vm644_vm0, %v641_v0, 0.0  ;;  %3382 = vmatpush3.bf16.msra.mxu0 %v3657_v10  ;;  %3390 = vmatpush3.bf16.msra.mxu1 %v3658_v11 }
  0x17   : > { %646 = vadd.xlane.f32.xlu0 %v645_v1  ;;  %3395 = vmatprep.subr.bf16.mxu0 %v3743_v9 }
  0x18   : > { %3403 = vmatprep.subr.bf16.mxu1 %v3743_v9 }
  0x1b   : > { %v3143_v16 = vld [vmem:[%s4411_s3] ss:$0 sm:$0xff]  ;;  %s638_s3 = scalar_lea.vmem %s4402_s20, %s3141_s23 }
  0xa4   : > { %v647_v2 = vpop.xlane.xlu0 %646 }
  0xa5   : > { %v649_v3 = vmul.f32 0.03125, %v647_v2 }
  0xa7   : > { %v650_v4 = vsub.f32 %v641_v0, %v649_v3 }
  0xa9   : > { %v651_v5 = vmul.f32 %v650_v4, %v650_v4 }
  0xab   : > { %v652_v6 = vsel %vm644_vm0, %v651_v5, 0.0 }
  0xac   : > { %653 = vadd.xlane.f32.xlu0 %v652_v6 }
 0x139   : > { %v654_v12 = vpop.xlane.xlu0 %653 }
 0x13a   : > { %v655_v13 = vmul.f32 0.03125, %v654_v12 }
 0x13c   : > { %v656_v14 = vadd.f32 1e-12, %v655_v13 }
 0x13e   : > { %3687 = vrsqrt.f32 %v656_v14 }
 0x148   : > { %v3688_v15 = vpop.eup %3687 }
 0x149   : > { %v658_v17 = vmul.f32 %v3688_v15, %v650_v4 }
 0x14b   : > { %v665_v19 = vmul.f32 %v3143_v16, %v658_v17 }
 0x14d   : > { %v3898_v20 = vadd.f32 %v3144_v18, %v665_v19 }
 0x14f   : > { %v673_v23 = vpack.c.bf16 %v3898_v20, %v3898_v20 }
 0x151   : > { %3384 = vmatmul.mubr.msk.bf16.vlgmr.msra.gmra.mrb[0].mxu0 %vm644_vm0, %v673_v23  ;;  %3392 = vmatmul.mubr.msk.bf16.vlgmr.msra.gmra.mrb[0].mxu1 %vm644_vm0, %v673_v23 }
 0x152   : > { %3396 = vmatpush3.bf16.msra.mxu0 %v3659_v21  ;;  %3404 = vmatpush3.bf16.msra.mxu1 %v3660_v22 }
 0x153   : > { %3397 = vmatprep.subr.bf16.mxu0 %v3743_v9  ;;  %3405 = vmatprep.subr.bf16.mxu1 %v3743_v9 }
 0x154   : > { %3399 = vmatprep.mubr.msk.bf16.mxu0 %vm3744_vm1, %v3743_v9  ;;  %3407 = vmatprep.mubr.msk.bf16.mxu1 %vm3744_vm1, %v3743_v9 }
 0x156   : > { %3398 = vmatpush3.bf16.msra.mxu0 %v3661_v24  ;;  %3406 = vmatpush3.bf16.msra.mxu1 %v3662_v25 }
 0x157   : > { %3411 = vmatprep.subr.bf16.mxu0 %v3743_v9  ;;  %3417 = vmatprep.subr.bf16.mxu1 %v3743_v9 }
 0x159   : > { %3400 = vmatmul.mubr.msk.bf16.vlgmr.msra.gmra.mrb[4].mxu0 %vm644_vm0, %v673_v23  ;;  %3408 = vmatmul.mubr.msk.bf16.vlgmr.msra.gmra.mrb[4].mxu1 %vm644_vm0, %v673_v23 }
 0x15a   : > { %3413 = vmatprep.mubr.msk.bf16.mxu0 %vm3744_vm1, %v3743_v9  ;;  %3419 = vmatprep.mubr.msk.bf16.mxu1 %vm3744_vm1, %v3743_v9 }
 0x224   : > { %v767_v27 = vpop.f32.mrb[0].mxu0  ;;  %v819_v29 = vpop.f32.mrb[0].mxu1 }
 0x225   : > { %v768_v30 = vadd.f32 %v3145_v26, %v767_v27  ;;  %v3385_v31 = vpop.f32.mrb[1].mxu0  ;;  %v3393_v32 = vpop.f32.mrb[1].mxu1  ;;  %v820_v36 = vadd.f32 %v3146_v28, %v819_v29 }
 0x226   : > { %v770_v33 = vpop.f32.mrb[2].mxu0  ;;  %v822_v34 = vpop.f32.mrb[2].mxu1 }
 0x227   : > { %v3936_v35 = vpack.c.bf16 %v768_v30, %v768_v30  ;;  %v3386_v37 = vpop.f32.mrb[3].mxu0  ;;  %v3394_v38 = vpop.f32.mrb[3].mxu1  ;;  %v3946_v41 = vpack.c.bf16 %v820_v36, %v820_v36 }
 0x229   : > { %940 = vrot.lane.b32.xlu1 %v3936_v35, %s3745_s30 }
 0x22c   : > { %v871_v42 = vpop.f32.mrb[4].mxu0  ;;  %v923_v43 = vpop.f32.mrb[4].mxu1 }
 0x22d   : > { %v872_v44 = vadd.f32 %v3147_v39, %v871_v42  ;;  %v924_v45 = vadd.f32 %v3148_v40, %v923_v43  ;;  %v3409_v46 = vpop.f32.mrb[5].mxu1  ;;  %990 = vrot.lane.b32.xlu1 %v3946_v41, %s3745_s30  ;;  %v3401_v47 = vpop.f32.mrb[5].mxu0 }
 0x22e   : > { %v874_v48 = vpop.f32.mrb[6].mxu0  ;;  %v926_v49 = vpop.f32.mrb[6].mxu1 }
 0x22f   : > { %v3950_v50 = vpack.c.bf16 %v872_v44, %v872_v44  ;;  %v3952_v51 = vpack.c.bf16 %v924_v45, %v924_v45  ;;  %v3402_v52 = vpop.f32.mrb[7].mxu0  ;;  %v3410_v53 = vpop.f32.mrb[7].mxu1 }
 0x231   : > { %1088 = vrot.lane.b32.xlu1 %v3952_v51, %s3745_s30  ;;  %1039 = vrot.lane.b32.xlu0 %v3950_v50, %s3745_s30 }
 0x29b   : > { %v941_v54 = vpop.permute.xlu1 %940 }
 0x29c   : > { %v947_v55 = vsel %vm942_vm2, %v941_v54, 0 }
 0x29d   : > { %3412 = vmatpush3.bf16.xpose.msra.mxu0 %v947_v55 }
 0x29e   : > { %3423 = vmatprep.subr.bf16.mxu0 %v3743_v9 }
 0x29f   : > { %v991_v56 = vpop.permute.xlu1 %990 }
 0x2a0   : > { %v996_v57 = vsel %vm942_vm2, %v991_v56, 0 }
 0x2a1   : > { %3418 = vmatpush3.bf16.xpose.msra.mxu1 %v996_v57 }
 0x2a2   : > { %3429 = vmatprep.subr.bf16.mxu1 %v3743_v9 }
 0x2a3   : > { %v1040_v58 = vpop.permute.xlu0 %1039  ;;  %v1089_v60 = vpop.permute.xlu1 %1088 }
 0x2a4   : > { %v1045_v59 = vsel %vm942_vm2, %v1040_v58, 0  ;;  %3414 = vmatmul.mubr.msk.bf16.vlgmr.msra.gmra.mrb[8].mxu0 %vm942_vm2, %v3936_v35  ;;  %v1094_v61 = vsel %vm942_vm2, %v1089_v60, 0 }
 0x2a5   : > { %3424 = vmatpush3.bf16.xpose.msra.mxu0 %v1045_v59  ;;  %3425 = vmatprep.mubr.msk.bf16.mxu0 %vm3744_vm1, %v3743_v9 }
 0x2a6   : > { %3435 = vmatprep.subr.bf16.mxu0 %v3743_v9 }
 0x2a8   : > { %3420 = vmatmul.mubr.msk.bf16.vlgmr.msra.gmra.mrb[8].mxu1 %vm942_vm2, %v3946_v41 }
 0x2a9   : > { %3430 = vmatpush3.bf16.xpose.msra.mxu1 %v1094_v61  ;;  %3431 = vmatprep.mubr.msk.bf16.mxu1 %vm3744_vm1, %v3743_v9 }
 0x2aa   : > { %3441 = vmatprep.subr.bf16.mxu1 %v3743_v9 }
 0x2ac   : > { %3426 = vmatmul.mubr.msk.bf16.vlgmr.msra.gmra.mrb[12].mxu0 %vm942_vm2, %v3950_v50 }
 0x2ad   : > { %3437 = vmatprep.mubr.msk.bf16.mxu0 %vm3744_vm1, %v3743_v9 }
 0x2b0   : > { %3432 = vmatmul.mubr.msk.bf16.vlgmr.msra.gmra.mrb[12].mxu1 %vm942_vm2, %v3952_v51 }
 0x2b1   : > { %3443 = vmatprep.mubr.msk.bf16.mxu1 %vm3744_vm1, %v3743_v9 }
 0x377   : > { %v983_v63 = vpop.f32.mrb[8].mxu0 }
 0x378   : > { %v984_v0 = vadd.f32 %v3986_v62, %v983_v63  ;;  %v3415_v1 = vpop.f32.mrb[9].mxu0 }
 0x379   : > { %v986_v2 = vpop.f32.mrb[10].mxu0 }
 0x37a   : > { %v3416_v3 = vpop.f32.mrb[11].mxu0  ;;  %v1136_v4 = vsel %vm942_vm2, %v984_v0, -inf }
 0x37b   : > { %v1032_v5 = vpop.f32.mrb[8].mxu1  ;;  %1137 = vmax.xlane.f32.xlu1 %v1136_v4 }
 0x37c   : > { %v1033_v6 = vadd.f32 %v3986_v62, %v1032_v5  ;;  %v3421_v7 = vpop.f32.mrb[9].mxu1 }
 0x37d   : > { %v1035_v8 = vpop.f32.mrb[10].mxu1 }
 0x37e   : > { %v3422_v10 = vpop.f32.mrb[11].mxu1  ;;  %v1139_v11 = vsel %vm942_vm2, %v1033_v6, -inf  ;;  %v1382_v8 = vld [vmem:[%s4388_s6 + $0x4] sm:$0xf] }
 0x37f   : > { %1140 = vmax.xlane.f32.xlu0 %v1139_v11  ;;  %v1081_v12 = vpop.f32.mrb[12].mxu0  ;;  %v1435_v10 = vsel %vm1189_vm3, %v1382_v8, 0  ;;  %v1383_v11 = vld [vmem:[%s4388_s6 + $0x8] sm:$0xf] }
 0x380   : > { %v1082_v13 = vadd.f32 %v3986_v62, %v1081_v12  ;;  %v3427_v14 = vpop.f32.mrb[13].mxu0 }
 0x381   : > { %v1084_v15 = vpop.f32.mrb[14].mxu0 }
 0x382   : > { %v3428_v16 = vpop.f32.mrb[15].mxu0  ;;  %v1142_v17 = vsel %vm942_vm2, %v1082_v13, -inf  ;;  %v1481_v15 = vsel %vm1189_vm3, %v1383_v11, 0  ;;  %v3175_v11 = vld [vmem:[%s4390_s8] ss:$0 sm:$0xff] }
 0x383   : > { %v1130_v18 = vpop.f32.mrb[12].mxu1  ;;  %1143 = vmax.xlane.f32.xlu1 %v1142_v17  ;;  %v1384_v17 = vld [vmem:[%s4388_s6 + $0xc] sm:$0xf] }
 0x384   : > { %v1131_v19 = vadd.f32 %v3986_v62, %v1130_v18  ;;  %v3433_v21 = vpop.f32.mrb[13].mxu1 }
 0x385   : > { %v1133_v22 = vpop.f32.mrb[14].mxu1 }
 0x386   : > { %v3434_v23 = vpop.f32.mrb[15].mxu1  ;;  %v1145_v24 = vsel %vm942_vm2, %v1131_v19, -inf }
 0x387   : > { %1146 = vmax.xlane.f32.xlu1 %v1145_v24  ;;  %v1527_v23 = vsel %vm1189_vm3, %v1384_v17, 0  ;;  %v3665_v17 = vld [vmem:[%s4394_s12] sm:$0xff]  }
 0x395   : > { %1184 = vrot.lane.b32.xlu0 %v3936_v35, %s3746_s4 }
 0x398   : > { %1233 = vrot.lane.b32.xlu1 %v3946_v41, %s3746_s4 }
 0x408   : > { %v1138_v25 = vpop.xlane.xlu1 %1137 }
 0x409   : > { %v1148_v26 = vsub.f32 %v984_v0, %v1138_v25  ;;  %v1381_v0 = vld [vmem:[%s4388_s6] sm:$0xf] }
 0x40a   : > { %v1389_v4 = vsel %vm1189_vm3, %v1381_v0, 0 }
 0x40b   : > { %v1152_v27 = vmul.f32 1.442695, %v1148_v26 }
 0x40c   : > { %v1141_v28 = vpop.xlane.xlu0 %1140 }
 0x40d   : > { %3689 = vpow2.f32 %v1152_v27  ;;  %v1149_v29 = vsub.f32 %v1033_v6, %v1141_v28 }
 0x40f   : > { %v1154_v30 = vmul.f32 1.442695, %v1149_v29 }
 0x410   : > { %v1185_v31 = vpop.permute.xlu0 %1184  ;;  %v1144_v32 = vpop.xlane.xlu1 %1143 }
 0x411   : > { %3691 = vpow2.f32 %v1154_v30  ;;  %v1191_v33 = vsel %vm1189_vm3, %v1185_v31, 0  ;;  %v1150_v34 = vsub.f32 %v1082_v13, %v1144_v32 }
 0x412   : > { %3436 = vmatpush3.bf16.msra.mxu0 %v1191_v33 }
 0x413   : > { %v1156_v36 = vmul.f32 1.442695, %v1150_v34  ;;  %3447 = vmatprep.subr.bf16.mxu0 %v3743_v9 }
 0x414   : > { %v1147_v35 = vpop.xlane.xlu1 %1146 }
 0x415   : > { %3693 = vpow2.f32 %v1156_v36  ;;  %v1151_v37 = vsub.f32 %v1131_v19, %v1147_v35 }
 0x417   : > { %v3690_v38 = vpop.eup %3689  ;;  %v1158_v39 = vmul.f32 1.442695, %v1151_v37 }
 0x418   : > { %v1234_v40 = vpop.permute.xlu1 %1233  ;;  %v1160_v41 = vsel %vm942_vm2, %v3690_v38, 0.0 }
 0x419   : > { %3695 = vpow2.f32 %v1158_v39  ;;  %v1239_v42 = vsel %vm1189_vm3, %v1234_v40, 0  ;;  %1161 = vadd.xlane.f32.xlu1 %v1160_v41 }
 0x41a   : > { %3442 = vmatpush3.bf16.msra.mxu1 %v1239_v42 }
 0x41b   : > { %v3692_v43 = vpop.eup %3691  ;;  %3453 = vmatprep.subr.bf16.mxu1 %v3743_v9 }
 0x41c   : > { %v1163_v44 = vsel %vm942_vm2, %v3692_v43, 0.0 }
 0x41d   : > { %1164 = vadd.xlane.f32.xlu1 %v1163_v44 }
 0x41f   : > { %v3694_v45 = vpop.eup %3693 }
 0x420   : > { %v1166_v46 = vsel %vm942_vm2, %v3694_v45, 0.0 }
 0x421   : > { %1167 = vadd.xlane.f32.xlu0 %v1166_v46 }
 0x423   : > { %v3696_v47 = vpop.eup %3695 }
 0x424   : > { %v1169_v48 = vsel %vm942_vm2, %v3696_v47, 0.0 }
 0x425   : > { %1170 = vadd.xlane.f32.xlu1 %v1169_v48 }
 0x436   : > { %1281 = vrot.lane.b32.xlu1 %v3950_v50, %s3746_s4 }
 0x437   : > { %1329 = vrot.lane.b32.xlu0 %v3952_v51, %s3746_s4 }
 0x4a6   : > { %v1162_v49 = vpop.xlane.xlu1 %1161 }
 0x4a7   : > { %3697 = vrcp.f32 %v1162_v49 }
 0x4aa   : > { %v1165_v52 = vpop.xlane.xlu1 %1164 }
 0x4ab   : > { %3699 = vrcp.f32 %v1165_v52 }
 0x4ae   : > { %v1168_v53 = vpop.xlane.xlu0 %1167 }
 0x4af   : > { %3701 = vrcp.f32 %v1168_v53 }
 0x4b1   : > { %v3698_v54 = vpop.eup %3697 }
 0x4b2   : > { %v1176_v55 = vmul.f32 %v3698_v54, %v3690_v38  ;;  %v1171_v56 = vpop.xlane.xlu1 %1170  ;;  %v1330_v50 = vpop.permute.xlu0 %1329 }
 0x4b3   : > { %3703 = vrcp.f32 %v1171_v56  ;;  %v1335_v2 = vsel %vm1189_vm3, %v1330_v50, 0 }
 0x4b4   : > { %v1180_v57 = vpack.c.bf16 %v1176_v55, %v1176_v55 }
 0x4b5   : > { %v3700_v58 = vpop.eup %3699 }
 0x4b6   : > { %v1177_v59 = vmul.f32 %v3700_v58, %v3692_v43  ;;  %3438 = vmatmul.mubr.msk.bf16.vlgmr.msra.gmra.mrb[16].mxu0 %vm942_vm2, %v1180_v57  ;;  %v1282_v60 = vpop.permute.xlu1 %1281  ;;  %v3174_v57 = vld [vmem:[%s4389_s7] ss:$0 sm:$0xff] }
 0x4b7   : > { %v1287_v61 = vsel %vm1189_vm3, %v1282_v60, 0  ;;  %3449 = vmatprep.mubr.msk.bf16.mxu0 %vm3744_vm1, %v3743_v9 }
 0x4b8   : > { %3448 = vmatpush3.bf16.msra.mxu0 %v1287_v61  ;;  %v1181_v51 = vpack.c.bf16 %v1177_v59, %v1177_v59 }
 0x4b9   : > { %v3702_v63 = vpop.eup %3701  ;;  %3459 = vmatprep.subr.bf16.mxu0 %v3743_v9 }
 0x4ba   : > { %v1178_v1 = vmul.f32 %v3702_v63, %v3694_v45  ;;  %3444 = vmatmul.mubr.msk.bf16.vlgmr.msra.gmra.mrb[16].mxu1 %vm942_vm2, %v1181_v51 }
 0x4bb   : > { %3454 = vmatpush3.bf16.msra.mxu1 %v1335_v2  ;;  %3455 = vmatprep.mubr.msk.bf16.mxu1 %vm3744_vm1, %v3743_v9 }
 0x4bc   : > { %v1182_v3 = vpack.c.bf16 %v1178_v1, %v1178_v1  ;;  %3465 = vmatprep.subr.bf16.mxu1 %v3743_v9 }
 0x4bd   : > { %v3704_v5 = vpop.eup %3703 }
 0x4be   : > { %v1179_v6 = vmul.f32 %v3704_v5, %v3696_v47  ;;  %3450 = vmatmul.mubr.msk.bf16.vlgmr.msra.gmra.mrb[20].mxu0 %vm942_vm2, %v1182_v3  ;;  %v3663_v5 = vld [vmem:[%s4392_s10] sm:$0xff]  }
 0x4bf   : > { %3460 = vmatpush3.bf16.msra.mxu0 %v1389_v4  ;;  %3461 = vmatprep.mubr.msk.bf16.mxu0 %vm3744_vm1, %v3743_v9 }
 0x4c0   : > { %v1183_v7 = vpack.c.bf16 %v1179_v6, %v1179_v6  ;;  %3471 = vmatprep.subr.bf16.mxu0 %v3743_v9  ;;  %v3664_v6 = vld [vmem:[%s4392_s10 + $0x8] sm:$0xff]  }
 0x4c2   : > { %3456 = vmatmul.mubr.msk.bf16.vlgmr.msra.gmra.mrb[20].mxu1 %vm942_vm2, %v1183_v7 }
 0x4c3   : > { %3467 = vmatprep.mubr.msk.bf16.mxu1 %vm3744_vm1, %v3743_v9  ;;  %3466 = vmatpush3.bf16.msra.mxu1 %v1435_v10 }
 0x4c4   : > { %3477 = vmatprep.subr.bf16.mxu1 %v3743_v9 }
 0x589   : > { %v1227_v12 = vpop.f32.mrb[16].mxu0 }
 0x58a   : > { %v1377_v13 = vpack.c.bf16 %v1227_v12, %v1227_v12  ;;  %v3439_v14 = vpop.f32.mrb[17].mxu0 }
 0x58b   : > { %v1230_v16 = vpop.f32.mrb[18].mxu0 }
 0x58c   : > { %v3440_v18 = vpop.f32.mrb[19].mxu0  ;;  %3462 = vmatmul.mubr.msk.bf16.vlgmr.msra.gmra.mrb[24].mxu0 %vm942_vm2, %v1377_v13  ;;  %v3176_v13 = vld [vmem:[%s4391_s9] ss:$0 sm:$0xff] }
 0x58d   : > { %v1275_v19 = vpop.f32.mrb[16].mxu1  ;;  %3472 = vmatpush3.bf16.msra.mxu0 %v1481_v15  ;;  %3473 = vmatprep.mubr.msk.bf16.mxu0 %vm3744_vm1, %v3743_v9  ;;  %v3666_v18 = vld [vmem:[%s4394_s12 + $0x8] sm:$0xff]  }
 0x58e   : > { %v1378_v21 = vpack.c.bf16 %v1275_v19, %v1275_v19  ;;  %v3445_v22 = vpop.f32.mrb[17].mxu1  ;;  %3483 = vmatprep.subr.bf16.mxu0 %v3743_v9  ;;  %v3667_v19 = vld [vmem:[%s4394_s12 + $0x10] sm:$0xff]  }
 0x58f   : > { %v1278_v24 = vpop.f32.mrb[18].mxu1  ;;  %v3177_v22 = vld [vmem:[%s4393_s11] ss:$0 sm:$0xff] }
 0x590   : > { %v3446_v25 = vpop.f32.mrb[19].mxu1  ;;  %3468 = vmatmul.mubr.msk.bf16.vlgmr.msra.gmra.mrb[24].mxu1 %vm942_vm2, %v1378_v21  ;;  %v3668_v21 = vld [vmem:[%s4394_s12 + $0x18] sm:$0xff]  }
 0x591   : > { %v1323_v26 = vpop.f32.mrb[20].mxu0  ;;  %3478 = vmatpush3.bf16.msra.mxu1 %v1527_v23  ;;  %3479 = vmatprep.mubr.msk.bf16.mxu1 %vm3744_vm1, %v3743_v9 }
 0x592   : > { %v1379_v27 = vpack.c.bf16 %v1323_v26, %v1323_v26  ;;  %v3451_v28 = vpop.f32.mrb[21].mxu0  ;;  %3491 = vmatprep.subr.bf16.mxu1 %v3743_v9 }
 0x593   : > { %v1326_v29 = vpop.f32.mrb[22].mxu0 }
 0x594   : > { %v3452_v30 = vpop.f32.mrb[23].mxu0  ;;  %3474 = vmatmul.mubr.msk.bf16.vlgmr.msra.gmra.mrb[28].mxu0 %vm942_vm2, %v1379_v27 }
 0x595   : > { %v1371_v31 = vpop.f32.mrb[20].mxu1  ;;  %3487 = vmatprep.mubr.msk.bf16.mxu0 %vm3744_vm1, %v3743_v9  ;;  %3484 = vmatpush3.bf16.msra.mxu0 %v3663_v5  ;;  %v3676_v5 = vld [vmem:[%s4410_s28 + $0x78] sm:$0xff]  }
 0x596   : > { %v1380_v32 = vpack.c.bf16 %v1371_v31, %v1371_v31  ;;  %v3457_v33 = vpop.f32.mrb[21].mxu1  ;;  %3485 = vmatprep.subr.bf16.mxu0 %v3743_v9 }
 0x597   : > { %v1374_v34 = vpop.f32.mrb[22].mxu1 }
 0x598   : > { %v3458_v36 = vpop.f32.mrb[23].mxu1  ;;  %3480 = vmatmul.mubr.msk.bf16.vlgmr.msra.gmra.mrb[28].mxu1 %vm942_vm2, %v1380_v32 }
 0x599   : > { %3499 = vmatprep.mubr.msk.bf16.mxu1 %vm3744_vm1, %v3743_v9  ;;  %3486 = vmatpush3.bf16.msra.mxu0 %v3664_v6  ;;  %v3209_v6 = vld [vmem:[%s4387_s5 + $0x4] ss:$0 sm:$0xff] }
 0x59a   : > { %3503 = vmatprep.subr.bf16.mxu0 %v3743_v9  ;;  %3492 = vmatpush3.bf16.msra.mxu1 %v3665_v17  ;;  %v3210_v17 = vld [vmem:[%s4387_s5 + $0x5] ss:$0 sm:$0xff] }
 0x59b   : > { %3493 = vmatprep.subr.bf16.mxu1 %v3743_v9 }
 0x59e   : > { %3494 = vmatpush3.bf16.msra.mxu1 %v3666_v18  ;;  %v3211_v18 = vld [vmem:[%s4387_s5 + $0x6] ss:$0 sm:$0xff] }
 0x59f   : > { %3495 = vmatprep.subr.bf16.mxu1 %v3743_v9 }
 0x5a2   : > { %3496 = vmatpush3.bf16.msra.mxu1 %v3667_v19 }
 0x5a3   : > { %3497 = vmatprep.subr.bf16.mxu1 %v3743_v9 }
 0x5a6   : > { %3498 = vmatpush3.bf16.msra.mxu1 %v3668_v21 }
 0x5a7   : > { %3519 = vmatprep.subr.bf16.mxu1 %v3743_v9 }
 0x65f   : > { %v1425_v35 = vpop.f32.mrb[24].mxu0 }
 0x660   : > { %v3463_v37 = vpop.f32.mrb[25].mxu0  ;;  %v1569_v41 = vsel %vm644_vm0, %v1425_v35, 0.0 }
 0x661   : > { %v1428_v38 = vpop.f32.mrb[26].mxu0 }
 0x662   : > { %v3464_v39 = vpop.f32.mrb[27].mxu0  ;;  %v3181_v38 = vld [vmem:[%s4395_s13] ss:$0 sm:$0xff] }
 0x663   : > { %v1471_v40 = vpop.f32.mrb[24].mxu1 }
 0x664   : > { %v1570_v42 = vsel %vm644_vm0, %v1471_v40, 0.0  ;;  %v3469_v43 = vpop.f32.mrb[25].mxu1 }
 0x665   : > { %v1571_v44 = vadd.f32 %v1570_v42, %v1569_v41  ;;  %v1474_v45 = vpop.f32.mrb[26].mxu1 }
 0x666   : > { %v3470_v46 = vpop.f32.mrb[27].mxu1 }
 0x667   : > { %v1517_v47 = vpop.f32.mrb[28].mxu0 }
 0x668   : > { %v1572_v48 = vsel %vm644_vm0, %v1517_v47, 0.0  ;;  %v3475_v49 = vpop.f32.mrb[29].mxu0 }
 0x669   : > { %v1573_v52 = vadd.f32 %v1572_v48, %v1571_v44  ;;  %v1520_v53 = vpop.f32.mrb[30].mxu0 }
 0x66a   : > { %v3476_v54 = vpop.f32.mrb[31].mxu0  ;;  %v3669_v53 = vld [vmem:[%s4410_s28 + $0x40] sm:$0xff]  }
 0x66b   : > { %v1563_v55 = vpop.f32.mrb[28].mxu1  ;;  %v3670_v54 = vld [vmem:[%s4410_s28 + $0x60] sm:$0xff]  }
 0x66c   : > { %v1574_v56 = vsel %vm644_vm0, %v1563_v55, 0.0  ;;  %v3481_v58 = vpop.f32.mrb[29].mxu1  ;;  %v3671_v55 = vld [vmem:[%s4410_s28 + $0x48] sm:$0xff]  }
 0x66d   : > { %v1575_v59 = vadd.f32 %v1574_v56, %v1573_v52  ;;  %v1566_v60 = vpop.f32.mrb[30].mxu1  ;;  %v3672_v56 = vld [vmem:[%s4410_s28 + $0x68] sm:$0xff]  }
 0x66e   : > { %v3482_v50 = vpop.f32.mrb[31].mxu1 }
 0x66f   : > { %v1583_v61 = vadd.f32 %v3174_v57, %v1575_v59  ;;  %v3187_v50 = vld [vmem:[%s4396_s14] ss:$0 sm:$0xff] }
 0x671   : > { %v1584_v51 = vadd.f32 %v1583_v61, %v3898_v20 }
 0x673   : > { %v1587_v63 = vsel %vm644_vm0, %v1584_v51, 0.0 }
 0x674   : > { %1588 = vadd.xlane.f32.xlu1 %v1587_v63 }
 0x701   : > { %v1589_v0 = vpop.xlane.xlu1 %1588 }
 0x702   : > { %v1590_v1 = vmul.f32 0.03125, %v1589_v0 }
 0x704   : > { %v1591_v2 = vsub.f32 %v1584_v51, %v1590_v1  ;;  %v3188_v51 = vld [vmem:[%s4397_s15] ss:$0 sm:$0xff]  ;;  %v3673_v1 = vld [vmem:[%s4410_s28 + $0x50] sm:$0xff]  }
 0x706   : > { %v1592_v3 = vmul.f32 %v1591_v2, %v1591_v2 }
 0x708   : > { %v1593_v4 = vsel %vm644_vm0, %v1592_v3, 0.0  ;;  %v3674_v3 = vld [vmem:[%s4410_s28 + $0x58] sm:$0xff]  }
 0x709   : > { %1594 = vadd.xlane.f32.xlu0 %v1593_v4  ;;  %v3675_v4 = vld [vmem:[%s4410_s28 + $0x70] sm:$0xff]  }
 0x796   : > { %v1595_v20 = vpop.xlane.xlu0 %1594 }
 0x797   : > { %v1596_v7 = vmul.f32 0.03125, %v1595_v20 }
 0x799   : > { %v1597_v8 = vadd.f32 1e-12, %v1596_v7 }
 0x79b   : > { %3705 = vrsqrt.f32 %v1597_v8 }
 0x7a5   : > { %v3706_v10 = vpop.eup %3705 }
 0x7a6   : > { %v1599_v12 = vmul.f32 %v3706_v10, %v1591_v2 }
 0x7a8   : > { %v1606_v14 = vmul.f32 %v3175_v11, %v1599_v12 }
 0x7aa   : > { %v1613_v15 = vadd.f32 %v3176_v13, %v1606_v14 }
 0x7ac   : > { %v1618_v16 = vpack.c.bf16 %v1613_v15, %v1613_v15 }
 0x7ae   : > { %3488 = vmatmul.mubr.msk.bf16.vlgmr.msra.gmra.mrb[32].mxu0 %vm644_vm0, %v1618_v16 }
 0x7af   : > { %3507 = vmatprep.mubr.msk.bf16.mxu0 %vm3744_vm1, %v3743_v9  ;;  %3504 = vmatpush3.bf16.msra.mxu0 %v3669_v53 }
 0x7b0   : > { %3505 = vmatprep.subr.bf16.mxu0 %v3743_v9 }
 0x7b3   : > { %3506 = vmatpush3.bf16.msra.mxu0 %v3671_v55 }
 0x7b4   : > { %3511 = vmatprep.subr.bf16.mxu0 %v3743_v9 }
 0x881   : > { %v1675_v23 = vpop.f32.mrb[32].mxu0 }
 0x882   : > { %v1676_v24 = vadd.f32 %v3177_v22, %v1675_v23  ;;  %v3489_v25 = vpop.f32.mrb[33].mxu0 }
 0x883   : > { %v1678_v26 = vpop.f32.mrb[34].mxu0 }
 0x884   : > { %v1682_v27 = vmul.f32 0.044715, %v1676_v24  ;;  %v3490_v28 = vpop.f32.mrb[35].mxu0  ;;  %v1681_v34 = vmul.f32 0.5, %v1676_v24 }
 0x886   : > { %v1683_v29 = vmul.f32 %v1682_v27, %v1676_v24  ;;  %v3212_v27 = vld [vmem:[%s4387_s5 + $0x7] ss:$0 sm:$0xff] }
 0x888   : > { %v1684_v30 = vmul.f32 %v1683_v29, %v1676_v24 }
 0x88a   : > { %v1685_v31 = vadd.f32 %v1684_v30, %v1676_v24 }
 0x88c   : > { %v1686_v32 = vmul.f32 0.7978846, %v1685_v31 }
 0x88e   : > { %3707 = vtanh.f32 %v1686_v32 }
 0x898   : > { %v3708_v33 = vpop.eup %3707 }
 0x899   : > { %v1688_v36 = vadd.f32 1.0, %v3708_v33 }
 0x89b   : > { %v1689_v35 = vmul.f32 %v1688_v36, %v1681_v34 }
 0x89d   : > { %v1698_v37 = vpack.c.bf16 %v1689_v35, %v1689_v35 }
 0x89f   : > { %3500 = vmatmul.mubr.msk.bf16.vlgmr.msra.gmra.mrb[32].mxu1 %vm1730_vm4, %v1698_v37 }
 0x8a0   : > { %3523 = vmatprep.mubr.msk.bf16.mxu1 %vm3744_vm1, %v3743_v9  ;;  %3520 = vmatpush3.bf16.msra.mxu1 %v3670_v54 }
 0x8a1   : > { %3521 = vmatprep.subr.bf16.mxu1 %v3743_v9 }
 0x8a4   : > { %3522 = vmatpush3.bf16.msra.mxu1 %v3672_v56 }
 0x8a5   : > { %3535 = vmatprep.subr.bf16.mxu1 %v3743_v9 }
 0x972   : > { %v1768_v39 = vpop.f32.mrb[32].mxu1 }
 0x973   : > { %v1769_v40 = vadd.f32 %v3181_v38, %v1768_v39  ;;  %v3501_v41 = vpop.f32.mrb[33].mxu1 }
 0x974   : > { %v1771_v42 = vpop.f32.mrb[34].mxu1 }
 0x975   : > { %v3502_v43 = vpop.f32.mrb[35].mxu1  ;;  %v1774_v44 = vadd.f32 %v1769_v40, %v1613_v15 }
 0x977   : > { %v1777_v45 = vsel %vm644_vm0, %v1774_v44, 0.0 }
 0x978   : > { %1778 = vadd.xlane.f32.xlu0 %v1777_v45 }
 0xa05   : > { %v1779_v46 = vpop.xlane.xlu0 %1778 }
 0xa06   : > { %v1780_v47 = vmul.f32 0.03125, %v1779_v46 }
 0xa08   : > { %v1781_v48 = vsub.f32 %v1774_v44, %v1780_v47 }
 0xa0a   : > { %v1782_v49 = vmul.f32 %v1781_v48, %v1781_v48 }
 0xa0c   : > { %v1783_v52 = vsel %vm644_vm0, %v1782_v49, 0.0 }
 0xa0d   : > { %1784 = vadd.xlane.f32.xlu1 %v1783_v52 }
 0xa9a   : > { %v1785_v57 = vpop.xlane.xlu1 %1784 }
 0xa9b   : > { %v1786_v58 = vmul.f32 0.03125, %v1785_v57 }
 0xa9d   : > { %v1787_v59 = vadd.f32 1e-12, %v1786_v58 }
 0xa9f   : > { %3709 = vrsqrt.f32 %v1787_v59 }
 0xaa9   : > { %v3710_v60 = vpop.eup %3709 }
 0xaaa   : > { %v1789_v61 = vmul.f32 %v3710_v60, %v1781_v48 }
 0xaac   : > { %v1796_v63 = vmul.f32 %v3187_v50, %v1789_v61 }
 0xaae   : > { %v4136_v0 = vadd.f32 %v3188_v51, %v1796_v63 }
 0xab0   : > { %v1804_v2 = vpack.c.bf16 %v4136_v0, %v4136_v0 }
 0xab2   : > { %3508 = vmatmul.mubr.msk.bf16.vlgmr.msra.gmra.mrb[36].mxu0 %vm644_vm0, %v1804_v2  ;;  %3524 = vmatmul.mubr.msk.bf16.vlgmr.msra.gmra.mrb[36].mxu1 %vm644_vm0, %v1804_v2 }
 0xab3   : > { %3512 = vmatpush3.bf16.msra.mxu0 %v3673_v1  ;;  %3515 = vmatprep.mubr.msk.bf16.mxu0 %vm3744_vm1, %v3743_v9 }
 0xab4   : > { %3513 = vmatprep.subr.bf16.mxu0 %v3743_v9  ;;  %3537 = vmatprep.mubr.msk.bf16.mxu1 %vm3744_vm1, %v3743_v9 }
 0xab7   : > { %3514 = vmatpush3.bf16.msra.mxu0 %v3674_v3 }
 0xab8   : > { %3527 = vmatprep.subr.bf16.mxu0 %v3743_v9 }
 0xaba   : > { %3516 = vmatmul.mubr.msk.bf16.vlgmr.msra.gmra.mrb[40].mxu0 %vm644_vm0, %v1804_v2 }
 0xabb   : > { %3528 = vmatpush3.bf16.msra.mxu0 %v3675_v4  ;;  %3531 = vmatprep.mubr.msk.bf16.mxu0 %vm3744_vm1, %v3743_v9 }
 0xabc   : > { %3529 = vmatprep.subr.bf16.mxu0 %v3743_v9 }
 0xabf   : > { %3530 = vmatpush3.bf16.msra.mxu0 %v3676_v5 }
 0xac0   : > { %3541 = vmatprep.subr.bf16.mxu0 %v3743_v9 }
 0xac2   : > { %3532 = vmatmul.mubr.msk.bf16.vlgmr.msra.gmra.mrb[44].mxu0 %vm644_vm0, %v1804_v2 }
 0xac3   : > { %3543 = vmatprep.mubr.msk.bf16.mxu0 %vm3744_vm1, %v3743_v9 }
 0xb85   : > { %v1900_v20 = vpop.f32.mrb[36].mxu0  ;;  %v2004_v7 = vpop.f32.mrb[36].mxu1 }
 0xb86   : > { %v1901_v8 = vadd.f32 %v3209_v6, %v1900_v20  ;;  %v3509_v10 = vpop.f32.mrb[37].mxu0  ;;  %v3525_v11 = vpop.f32.mrb[37].mxu1  ;;  %v2005_v24 = vadd.f32 %v3211_v18, %v2004_v7 }
 0xb87   : > { %v1903_v12 = vpop.f32.mrb[38].mxu0  ;;  %v2007_v13 = vpop.f32.mrb[38].mxu1 }
 0xb88   : > { %v4171_v14 = vpack.c.bf16 %v1901_v8, %v1901_v8  ;;  %v3510_v15 = vpop.f32.mrb[39].mxu0  ;;  %v3526_v16 = vpop.f32.mrb[39].mxu1  ;;  %v4188_v28 = vpack.c.bf16 %v2005_v24, %v2005_v24 }
 0xb8a   : > { %2067 = vrot.lane.b32.xlu0 %v4171_v14, %s3745_s30 }
 0xb8d   : > { %v1952_v19 = vpop.f32.mrb[40].mxu0 }
 0xb8e   : > { %v1953_v21 = vadd.f32 %v3210_v17, %v1952_v19  ;;  %v3517_v22 = vpop.f32.mrb[41].mxu0 }
 0xb8f   : > { %v1955_v23 = vpop.f32.mrb[42].mxu0 }
 0xb90   : > { %v4181_v25 = vpack.c.bf16 %v1953_v21, %v1953_v21  ;;  %v3518_v26 = vpop.f32.mrb[43].mxu0 }
 0xb92   : > { %2116 = vrot.lane.b32.xlu1 %v4181_v25, %s3745_s30 }
 0xb95   : > { %v2056_v29 = vpop.f32.mrb[44].mxu0 }
 0xb96   : > { %v2057_v30 = vadd.f32 %v3212_v27, %v2056_v29  ;;  %2165 = vrot.lane.b32.xlu1 %v4188_v28, %s3745_s30  ;;  %v3533_v31 = vpop.f32.mrb[45].mxu0 }
 0xb97   : > { %v2059_v32 = vpop.f32.mrb[46].mxu0 }
 0xb98   : > { %v4192_v33 = vpack.c.bf16 %v2057_v30, %v2057_v30  ;;  %v3534_v34 = vpop.f32.mrb[47].mxu0 }
 0xb9a   : > { %2214 = vrot.lane.b32.xlu0 %v4192_v33, %s3745_s30 }
 0xbfc   : > { %v2068_v36 = vpop.permute.xlu0 %2067 }
 0xbfd   : > { %v2073_v35 = vsel %vm942_vm2, %v2068_v36, 0 }
 0xbfe   : > { %3536 = vmatpush3.bf16.xpose.msra.mxu1 %v2073_v35 }
 0xbff   : > { %3547 = vmatprep.subr.bf16.mxu1 %v3743_v9 }
 0xc04   : > { %v2117_v37 = vpop.permute.xlu1 %2116 }
 0xc05   : > { %v2122_v38 = vsel %vm942_vm2, %v2117_v37, 0  ;;  %3538 = vmatmul.mubr.msk.bf16.vlgmr.msra.gmra.mrb[40].mxu1 %vm942_vm2, %v4171_v14 }
 0xc06   : > { %3542 = vmatpush3.bf16.xpose.msra.mxu0 %v2122_v38  ;;  %3549 = vmatprep.mubr.msk.bf16.mxu1 %vm3744_vm1, %v3743_v9 }
 0xc07   : > { %3553 = vmatprep.subr.bf16.mxu0 %v3743_v9 }
 0xc08   : > { %v2166_v39 = vpop.permute.xlu1 %2165 }
 0xc09   : > { %v2171_v40 = vsel %vm942_vm2, %v2166_v39, 0 }
 0xc0a   : > { %3548 = vmatpush3.bf16.xpose.msra.mxu1 %v2171_v40 }
 0xc0b   : > { %3559 = vmatprep.subr.bf16.mxu1 %v3743_v9 }
 0xc0c   : > { %v2215_v41 = vpop.permute.xlu0 %2214 }
 0xc0d   : > { %v2220_v42 = vsel %vm942_vm2, %v2215_v41, 0  ;;  %3544 = vmatmul.mubr.msk.bf16.vlgmr.msra.gmra.mrb[48].mxu0 %vm942_vm2, %v4181_v25 }
 0xc0e   : > { %3554 = vmatpush3.bf16.xpose.msra.mxu0 %v2220_v42  ;;  %3555 = vmatprep.mubr.msk.bf16.mxu0 %vm3744_vm1, %v3743_v9 }
 0xc0f   : > { %3565 = vmatprep.subr.bf16.mxu0 %v3743_v9 }
 0xc11   : > { %3550 = vmatmul.mubr.msk.bf16.vlgmr.msra.gmra.mrb[44].mxu1 %vm942_vm2, %v4188_v28 }
 0xc12   : > { %3561 = vmatprep.mubr.msk.bf16.mxu1 %vm3744_vm1, %v3743_v9 }
 0xc15   : > { %3556 = vmatmul.mubr.msk.bf16.vlgmr.msra.gmra.mrb[52].mxu0 %vm942_vm2, %v4192_v33 }
 0xc16   : > { %3567 = vmatprep.mubr.msk.bf16.mxu0 %vm3744_vm1, %v3743_v9 }
 0xcd8   : > { %v2109_v43 = vpop.f32.mrb[40].mxu1 }
 0xcd9   : > { %v2110_v44 = vadd.f32 %v3986_v62, %v2109_v43  ;;  %v3539_v45 = vpop.f32.mrb[41].mxu1 }
 0xcda   : > { %v2112_v46 = vpop.f32.mrb[42].mxu1 }
 0xcdb   : > { %v3540_v47 = vpop.f32.mrb[43].mxu1  ;;  %v2262_v48 = vsel %vm942_vm2, %v2110_v44, -inf }
 0xcdc   : > { %2263 = vmax.xlane.f32.xlu1 %v2262_v48 }
 0xce0   : > { %v2158_v49 = vpop.f32.mrb[48].mxu0 }
 0xce1   : > { %v2159_v52 = vadd.f32 %v3986_v62, %v2158_v49  ;;  %v3545_v53 = vpop.f32.mrb[49].mxu0  ;;  %v3233_v49 = vld [vmem:[%s4388_s6 + $0x10] sm:$0xf] }
 0xce2   : > { %v2161_v54 = vpop.f32.mrb[50].mxu0  ;;  %v3234_v53 = vld [vmem:[%s4388_s6 + $0x14] sm:$0xf] }
 0xce3   : > { %v3546_v55 = vpop.f32.mrb[51].mxu0  ;;  %v2265_v56 = vsel %vm942_vm2, %v2159_v52, -inf  ;;  %v2561_v54 = vsel %vm1189_vm3, %v3234_v53, 0 }
 0xce4   : > { %v2207_v57 = vpop.f32.mrb[44].mxu1  ;;  %2266 = vmax.xlane.f32.xlu0 %v2265_v56  ;;  %v3235_v55 = vld [vmem:[%s4388_s6 + $0x18] sm:$0xf] }
 0xce5   : > { %v2208_v58 = vadd.f32 %v3986_v62, %v2207_v57  ;;  %v3551_v59 = vpop.f32.mrb[45].mxu1 }
 0xce6   : > { %v2210_v60 = vpop.f32.mrb[46].mxu1  ;;  %v2607_v59 = vsel %vm1189_vm3, %v3235_v55, 0 }
 0xce7   : > { %v3552_v50 = vpop.f32.mrb[47].mxu1  ;;  %v2268_v61 = vsel %vm942_vm2, %v2208_v58, -inf }
 0xce8   : > { %2269 = vmax.xlane.f32.xlu0 %v2268_v61  ;;  %v2256_v51 = vpop.f32.mrb[52].mxu0  ;;  %v3236_v61 = vld [vmem:[%s4388_s6 + $0x1c] sm:$0xf] }
 0xce9   : > { %v2257_v63 = vadd.f32 %v3986_v62, %v2256_v51  ;;  %v3557_v1 = vpop.f32.mrb[53].mxu0 }
 0xcea   : > { %v2259_v2 = vpop.f32.mrb[54].mxu0 }
 0xceb   : > { %v3558_v3 = vpop.f32.mrb[55].mxu0  ;;  %v2271_v4 = vsel %vm942_vm2, %v2257_v63, -inf  ;;  %v2653_v2 = vsel %vm1189_vm3, %v3236_v61, 0  ;;  %v3681_v61 = vld [vmem:[%s4394_s12 + $0x30] sm:$0xff]  }
 0xcec   : > { %2272 = vmax.xlane.f32.xlu1 %v2271_v4 }
 0xcfd   : > { %2358 = vrot.lane.b32.xlu1 %v4181_v25, %s3746_s4 }
 0xcfe   : > { %2310 = vrot.lane.b32.xlu0 %v4171_v14, %s3746_s4 }
 0xd69   : > { %v2264_v5 = vpop.xlane.xlu1 %2263 }
 0xd6a   : > { %v2274_v6 = vsub.f32 %v2110_v44, %v2264_v5 }
 0xd6c   : > { %v2278_v20 = vmul.f32 1.442695, %v2274_v6 }
 0xd6e   : > { %3711 = vpow2.f32 %v2278_v20 }
 0xd71   : > { %v2267_v7 = vpop.xlane.xlu0 %2266 }
 0xd72   : > { %v2275_v8 = vsub.f32 %v2159_v52, %v2267_v7  ;;  %v2515_v52 = vsel %vm1189_vm3, %v3233_v49, 0 }
 0xd74   : > { %v2280_v10 = vmul.f32 1.442695, %v2275_v8 }
 0xd75   : > { %v2270_v62 = vpop.xlane.xlu0 %2269 }
 0xd76   : > { %3713 = vpow2.f32 %v2280_v10  ;;  %v2276_v11 = vsub.f32 %v2208_v58, %v2270_v62 }
 0xd78   : > { %v3712_v12 = vpop.eup %3711  ;;  %v2282_v13 = vmul.f32 1.442695, %v2276_v11 }
 0xd79   : > { %v2311_v15 = vpop.permute.xlu0 %2310  ;;  %v2273_v16 = vpop.xlane.xlu1 %2272  ;;  %v2286_v17 = vsel %vm942_vm2, %v3712_v12, 0.0 }
 0xd7a   : > { %3715 = vpow2.f32 %v2282_v13  ;;  %v2316_v18 = vsel %vm1189_vm3, %v2311_v15, 0  ;;  %v2277_v14 = vsub.f32 %v2257_v63, %v2273_v16  ;;  %2287 = vadd.xlane.f32.xlu0 %v2286_v17 }
 0xd7b   : > { %3560 = vmatpush3.bf16.msra.mxu1 %v2316_v18 }
 0xd7c   : > { %v2284_v19 = vmul.f32 1.442695, %v2277_v14  ;;  %3571 = vmatprep.subr.bf16.mxu1 %v3743_v9 }
 0xd7d   : > { %v2359_v21 = vpop.permute.xlu1 %2358 }
 0xd7e   : > { %3717 = vpow2.f32 %v2284_v19  ;;  %v2364_v22 = vsel %vm1189_vm3, %v2359_v21, 0 }
 0xd7f   : > { %3566 = vmatpush3.bf16.msra.mxu0 %v2364_v22 }
 0xd80   : > { %v3714_v23 = vpop.eup %3713  ;;  %3577 = vmatprep.subr.bf16.mxu0 %v3743_v9 }
 0xd81   : > { %v2289_v24 = vsel %vm942_vm2, %v3714_v23, 0.0 }
 0xd82   : > { %2290 = vadd.xlane.f32.xlu1 %v2289_v24 }
 0xd84   : > { %v3716_v25 = vpop.eup %3715 }
 0xd85   : > { %v2292_v26 = vsel %vm942_vm2, %v3716_v25, 0.0 }
 0xd86   : > { %2293 = vadd.xlane.f32.xlu0 %v2292_v26 }
 0xd88   : > { %v3718_v27 = vpop.eup %3717 }
 0xd89   : > { %v2295_v29 = vsel %vm942_vm2, %v3718_v27, 0.0 }
 0xd8a   : > { %2296 = vadd.xlane.f32.xlu1 %v2295_v29 }
 0xd9b   : > { %2406 = vrot.lane.b32.xlu1 %v4188_v28, %s3746_s4 }
 0xd9c   : > { %2454 = vrot.lane.b32.xlu0 %v4192_v33, %s3746_s4 }
 0xe07   : > { %v2288_v30 = vpop.xlane.xlu0 %2287 }
 0xe08   : > { %3719 = vrcp.f32 %v2288_v30 }
 0xe0f   : > { %v2291_v31 = vpop.xlane.xlu1 %2290 }
 0xe10   : > { %3721 = vrcp.f32 %v2291_v31 }
 0xe12   : > { %v3720_v32 = vpop.eup %3719 }
 0xe13   : > { %v2302_v34 = vmul.f32 %v3720_v32, %v3712_v12  ;;  %v2294_v36 = vpop.xlane.xlu0 %2293 }
 0xe14   : > { %3723 = vrcp.f32 %v2294_v36 }
 0xe15   : > { %v2306_v35 = vpack.c.bf16 %v2302_v34, %v2302_v34 }
 0xe17   : > { %3562 = vmatmul.mubr.msk.bf16.vlgmr.msra.gmra.mrb[48].mxu1 %vm942_vm2, %v2306_v35  ;;  %v2297_v37 = vpop.xlane.xlu1 %2296  ;;  %v2455_v33 = vpop.permute.xlu0 %2454  ;;  %v3242_v35 = vld [vmem:[%s4389_s7 + $0x1] ss:$0 sm:$0xff] }
 0xe18   : > { %3725 = vrcp.f32 %v2297_v37  ;;  %3573 = vmatprep.mubr.msk.bf16.mxu1 %vm3744_vm1, %v3743_v9  ;;  %v2460_v44 = vsel %vm1189_vm3, %v2455_v33, 0 }
 0xe1a   : > { %v3722_v28 = vpop.eup %3721 }
 0xe1b   : > { %v2303_v38 = vmul.f32 %v3722_v28, %v3714_v23  ;;  %v2407_v39 = vpop.permute.xlu1 %2406 }
 0xe1c   : > { %v2412_v40 = vsel %vm1189_vm3, %v2407_v39, 0 }
 0xe1d   : > { %3572 = vmatpush3.bf16.msra.mxu1 %v2412_v40  ;;  %v2307_v41 = vpack.c.bf16 %v2303_v38, %v2303_v38 }
 0xe1e   : > { %v3724_v42 = vpop.eup %3723  ;;  %3583 = vmatprep.subr.bf16.mxu1 %v3743_v9 }
 0xe1f   : > { %v2304_v43 = vmul.f32 %v3724_v42, %v3716_v25  ;;  %3568 = vmatmul.mubr.msk.bf16.vlgmr.msra.gmra.mrb[56].mxu0 %vm942_vm2, %v2307_v41 }
 0xe20   : > { %3578 = vmatpush3.bf16.msra.mxu0 %v2460_v44  ;;  %3579 = vmatprep.mubr.msk.bf16.mxu0 %vm3744_vm1, %v3743_v9 }
 0xe21   : > { %v2308_v45 = vpack.c.bf16 %v2304_v43, %v2304_v43  ;;  %3589 = vmatprep.subr.bf16.mxu0 %v3743_v9 }
 0xe22   : > { %v3726_v46 = vpop.eup %3725 }
 0xe23   : > { %v2305_v47 = vmul.f32 %v3726_v46, %v3718_v27  ;;  %3574 = vmatmul.mubr.msk.bf16.vlgmr.msra.gmra.mrb[52].mxu1 %vm942_vm2, %v2308_v45 }
 0xe24   : > { %3585 = vmatprep.mubr.msk.bf16.mxu1 %vm3744_vm1, %v3743_v9  ;;  %3584 = vmatpush3.bf16.msra.mxu1 %v2515_v52 }
 0xe25   : > { %v2309_v48 = vpack.c.bf16 %v2305_v47, %v2305_v47  ;;  %3595 = vmatprep.subr.bf16.mxu1 %v3743_v9  ;;  %v3677_v47 = vld [vmem:[%s4392_s10 + $0x10] sm:$0xff]  }
 0xe27   : > { %3580 = vmatmul.mubr.msk.bf16.vlgmr.msra.gmra.mrb[60].mxu0 %vm942_vm2, %v2309_v48  ;;  %v3678_v48 = vld [vmem:[%s4392_s10 + $0x18] sm:$0xff]  }
 0xe28   : > { %3591 = vmatprep.mubr.msk.bf16.mxu0 %vm3744_vm1, %v3743_v9  ;;  %3590 = vmatpush3.bf16.msra.mxu0 %v2561_v54  ;;  %v3245_v54 = vld [vmem:[%s4390_s8 + $0x1] ss:$0 sm:$0xff] }
 0xe29   : > { %3601 = vmatprep.subr.bf16.mxu0 %v3743_v9 }
 0xeea   : > { %v2352_v56 = vpop.f32.mrb[48].mxu1 }
 0xeeb   : > { %v2502_v57 = vpack.c.bf16 %v2352_v56, %v2352_v56  ;;  %v3563_v58 = vpop.f32.mrb[49].mxu1  ;;  %v3246_v56 = vld [vmem:[%s4391_s9 + $0x1] ss:$0 sm:$0xff] }
 0xeec   : > { %v2355_v60 = vpop.f32.mrb[50].mxu1 }
 0xeed   : > { %v3564_v50 = vpop.f32.mrb[51].mxu1  ;;  %3586 = vmatmul.mubr.msk.bf16.vlgmr.msra.gmra.mrb[56].mxu1 %vm942_vm2, %v2502_v57  ;;  %v3679_v60 = vld [vmem:[%s4394_s12 + $0x20] sm:$0xff]  }
 0xeee   : > { %3596 = vmatpush3.bf16.msra.mxu1 %v2607_v59  ;;  %3597 = vmatprep.mubr.msk.bf16.mxu1 %vm3744_vm1, %v3743_v9  ;;  %v3680_v50 = vld [vmem:[%s4394_s12 + $0x28] sm:$0xff]  }
 0xeef   : > { %3607 = vmatprep.subr.bf16.mxu1 %v3743_v9 }
 0xef2   : > { %v2400_v51 = vpop.f32.mrb[56].mxu0 }
 0xef3   : > { %v2503_v63 = vpack.c.bf16 %v2400_v51, %v2400_v51  ;;  %v3569_v1 = vpop.f32.mrb[57].mxu0  ;;  %v3682_v51 = vld [vmem:[%s4394_s12 + $0x38] sm:$0xff]  }
 0xef4   : > { %v2403_v3 = vpop.f32.mrb[58].mxu0 }
 0xef5   : > { %v3570_v4 = vpop.f32.mrb[59].mxu0  ;;  %3592 = vmatmul.mubr.msk.bf16.vlgmr.msra.gmra.mrb[64].mxu0 %vm942_vm2, %v2503_v63  ;;  %v3252_v63 = vld [vmem:[%s4393_s11 + $0x1] ss:$0 sm:$0xff] }
 0xef6   : > { %v2448_v5 = vpop.f32.mrb[52].mxu1  ;;  %3602 = vmatpush3.bf16.msra.mxu0 %v2653_v2  ;;  %3603 = vmatprep.mubr.msk.bf16.mxu0 %vm3744_vm1, %v3743_v9 }
 0xef7   : > { %v2504_v6 = vpack.c.bf16 %v2448_v5, %v2448_v5  ;;  %v3575_v20 = vpop.f32.mrb[53].mxu1  ;;  %3615 = vmatprep.subr.bf16.mxu0 %v3743_v9 }
 0xef8   : > { %v2451_v7 = vpop.f32.mrb[54].mxu1 }
 0xef9   : > { %v3576_v8 = vpop.f32.mrb[55].mxu1  ;;  %3598 = vmatmul.mubr.msk.bf16.vlgmr.msra.gmra.mrb[60].mxu1 %vm942_vm2, %v2504_v6 }
 0xefa   : > { %v2496_v10 = vpop.f32.mrb[60].mxu0  ;;  %3611 = vmatprep.mubr.msk.bf16.mxu1 %vm3744_vm1, %v3743_v9  ;;  %3608 = vmatpush3.bf16.msra.mxu1 %v3677_v47 }
 0xefb   : > { %v2505_v62 = vpack.c.bf16 %v2496_v10, %v2496_v10  ;;  %v3581_v11 = vpop.f32.mrb[61].mxu0  ;;  %3609 = vmatprep.subr.bf16.mxu1 %v3743_v9 }
 0xefc   : > { %v2499_v12 = vpop.f32.mrb[62].mxu0 }
 0xefd   : > { %v3582_v13 = vpop.f32.mrb[63].mxu0  ;;  %3604 = vmatmul.mubr.msk.bf16.vlgmr.msra.gmra.mrb[68].mxu0 %vm942_vm2, %v2505_v62 }
 0xefe   : > { %3623 = vmatprep.mubr.msk.bf16.mxu0 %vm3744_vm1, %v3743_v9  ;;  %3610 = vmatpush3.bf16.msra.mxu1 %v3678_v48 }
 0xeff   : > { %3627 = vmatprep.subr.bf16.mxu1 %v3743_v9  ;;  %3616 = vmatpush3.bf16.msra.mxu0 %v3679_v60 }
 0xf00   : > { %3617 = vmatprep.subr.bf16.mxu0 %v3743_v9 }
 0xf03   : > { %3618 = vmatpush3.bf16.msra.mxu0 %v3680_v50 }
 0xf04   : > { %3619 = vmatprep.subr.bf16.mxu0 %v3743_v9 }
 0xf07   : > { %3620 = vmatpush3.bf16.msra.mxu0 %v3681_v61 }
 0xf08   : > { %3621 = vmatprep.subr.bf16.mxu0 %v3743_v9 }
 0xf0b   : > { %3622 = vmatpush3.bf16.msra.mxu0 %v3682_v51 }
 0xfc0   : > { %v2551_v15 = vpop.f32.mrb[56].mxu1 }
 0xfc1   : > { %v3587_v16 = vpop.f32.mrb[57].mxu1  ;;  %v2695_v19 = vsel %vm644_vm0, %v2551_v15, 0.0 }
 0xfc2   : > { %v2554_v17 = vpop.f32.mrb[58].mxu1  ;;  %v3265_v16 = vld [vmem:[%s4395_s13 + $0x1] ss:$0 sm:$0xff] }
 0xfc3   : > { %v3588_v18 = vpop.f32.mrb[59].mxu1 }
 0xfc8   : > { %v2597_v14 = vpop.f32.mrb[64].mxu0 }
 0xfc9   : > { %v2696_v21 = vsel %vm644_vm0, %v2597_v14, 0.0  ;;  %v3593_v22 = vpop.f32.mrb[65].mxu0 }
 0xfca   : > { %v2697_v23 = vadd.f32 %v2696_v21, %v2695_v19  ;;  %v2600_v24 = vpop.f32.mrb[66].mxu0 }
 0xfcb   : > { %v3594_v25 = vpop.f32.mrb[67].mxu0 }
 0xfcc   : > { %v2643_v26 = vpop.f32.mrb[60].mxu1 }
 0xfcd   : > { %v2698_v27 = vsel %vm644_vm0, %v2643_v26, 0.0  ;;  %v3599_v29 = vpop.f32.mrb[61].mxu1 }
 0xfce   : > { %v2699_v30 = vadd.f32 %v2698_v27, %v2697_v23  ;;  %v2646_v31 = vpop.f32.mrb[62].mxu1 }
 0xfcf   : > { %v3600_v32 = vpop.f32.mrb[63].mxu1  ;;  %v3684_v31 = vld [vmem:[%s4398_s16 + $0x8] sm:$0xff]  }
 0xfd0   : > { %v2689_v34 = vpop.f32.mrb[68].mxu0 }
 0xfd1   : > { %v2700_v36 = vsel %vm644_vm0, %v2689_v34, 0.0  ;;  %v3605_v37 = vpop.f32.mrb[69].mxu0 }
 0xfd2   : > { %v2701_v28 = vadd.f32 %v2700_v36, %v2699_v30  ;;  %v2692_v38 = vpop.f32.mrb[70].mxu0  ;;  %v3683_v30 = vld [vmem:[%s4398_s16] sm:$0xff]  }
 0xfd3   : > { %v3606_v39 = vpop.f32.mrb[71].mxu0  ;;  %v3273_v37 = vld [vmem:[%s4396_s14 + $0x1] ss:$0 sm:$0xff] }
 0xfd4   : > { %v2710_v33 = vadd.f32 %v3242_v35, %v2701_v28  ;;  %v3274_v38 = vld [vmem:[%s4397_s15 + $0x1] ss:$0 sm:$0xff] }
 0xfd6   : > { %v2711_v40 = vadd.f32 %v2710_v33, %v4136_v0 }
 0xfd8   : > { %v2716_v41 = vsel %vm644_vm0, %v2711_v40, 0.0 }
 0xfd9   : > { %2717 = vadd.xlane.f32.xlu1 %v2716_v41  ;;  %v3685_v41 = vld [vmem:[%s4400_s18] sm:$0xff]  }
0x1066   : > { %v2718_v42 = vpop.xlane.xlu1 %2717 }
0x1067   : > { %v2719_v43 = vmul.f32 0.03125, %v2718_v42  ;;  %v3686_v42 = vld [vmem:[%s4400_s18 + $0x8] sm:$0xff]  }
0x1069   : > { %v2720_v44 = vsub.f32 %v2711_v40, %v2719_v43  ;;  %v3275_v43 = vld [vmem:[%s4399_s17] ss:$0 sm:$0xff] }
0x106b   : > { %v2721_v45 = vmul.f32 %v2720_v44, %v2720_v44 }
0x106d   : > { %v2722_v46 = vsel %vm644_vm0, %v2721_v45, 0.0 }
0x106e   : > { %2723 = vadd.xlane.f32.xlu0 %v2722_v46 }
0x10fb   : > { %v2724_v0 = vpop.xlane.xlu0 %2723 }
0x10fc   : > { %v2725_v49 = vmul.f32 0.03125, %v2724_v0 }
0x10fe   : > { %v2726_v52 = vadd.f32 1e-12, %v2725_v49 }
0x1100   : > { %3727 = vrsqrt.f32 %v2726_v52 }
0x110a   : > { %v3728_v53 = vpop.eup %3727 }
0x110b   : > { %v2728_v55 = vmul.f32 %v3728_v53, %v2720_v44 }
0x110d   : > { %v2735_v57 = vmul.f32 %v3245_v54, %v2728_v55 }
0x110f   : > { %v2742_v58 = vadd.f32 %v3246_v56, %v2735_v57 }
0x1111   : > { %v2748_v59 = vpack.c.bf16 %v2742_v58, %v2742_v58 }
0x1113   : > { %3612 = vmatmul.mubr.msk.bf16.vlgmr.msra.gmra.mrb[64].mxu1 %vm644_vm0, %v2748_v59 }
0x1114   : > { %3631 = vmatprep.mubr.msk.bf16.mxu1 %vm3744_vm1, %v3743_v9  ;;  %3628 = vmatpush3.bf16.msra.mxu1 %v3683_v30 }
0x1115   : > { %3629 = vmatprep.subr.bf16.mxu1 %v3743_v9 }
0x1118   : > { %3630 = vmatpush3.bf16.msra.mxu1 %v3684_v31 }
0x1119   : > { %3635 = vmatprep.subr.bf16.mxu1 %v3743_v9 }
0x11e6   : > { %v2806_v1 = vpop.f32.mrb[64].mxu1 }
0x11e7   : > { %v2807_v2 = vadd.f32 %v3252_v63, %v2806_v1  ;;  %v3613_v3 = vpop.f32.mrb[65].mxu1 }
0x11e8   : > { %v2809_v4 = vpop.f32.mrb[66].mxu1 }
0x11e9   : > { %v2813_v5 = vmul.f32 0.044715, %v2807_v2  ;;  %v3614_v6 = vpop.f32.mrb[67].mxu1  ;;  %v2812_v11 = vmul.f32 0.5, %v2807_v2 }
0x11eb   : > { %v2814_v20 = vmul.f32 %v2813_v5, %v2807_v2 }
0x11ed   : > { %v2815_v7 = vmul.f32 %v2814_v20, %v2807_v2 }
0x11ef   : > { %v2816_v8 = vadd.f32 %v2815_v7, %v2807_v2 }
0x11f1   : > { %v2817_v10 = vmul.f32 0.7978846, %v2816_v8 }
0x11f3   : > { %3729 = vtanh.f32 %v2817_v10 }
0x11fd   : > { %v3730_v62 = vpop.eup %3729 }
0x11fe   : > { %v2819_v12 = vadd.f32 1.0, %v3730_v62 }
0x1200   : > { %v2820_v13 = vmul.f32 %v2819_v12, %v2812_v11 }
0x1202   : > { %v2830_v15 = vpack.c.bf16 %v2820_v13, %v2820_v13 }
0x1204   : > { %3624 = vmatmul.mubr.msk.bf16.vlgmr.msra.gmra.mrb[72].mxu0 %vm1730_vm4, %v2830_v15 }
0x12d7   : > { %v2900_v17 = vpop.f32.mrb[72].mxu0 }
0x12d8   : > { %v2901_v18 = vadd.f32 %v3265_v16, %v2900_v17  ;;  %v3625_v14 = vpop.f32.mrb[73].mxu0 }
0x12d9   : > { %v2903_v19 = vpop.f32.mrb[74].mxu0 }
0x12da   : > { %v3626_v21 = vpop.f32.mrb[75].mxu0  ;;  %v2906_v22 = vadd.f32 %v2901_v18, %v2742_v58 }
0x12dc   : > { %v2911_v23 = vsel %vm644_vm0, %v2906_v22, 0.0 }
0x12dd   : > { %2912 = vadd.xlane.f32.xlu0 %v2911_v23 }
0x136a   : > { %v2913_v24 = vpop.xlane.xlu0 %2912 }
0x136b   : > { %v2914_v25 = vmul.f32 0.03125, %v2913_v24 }
0x136d   : > { %v2915_v26 = vsub.f32 %v2906_v22, %v2914_v25 }
0x136f   : > { %v2916_v27 = vmul.f32 %v2915_v26, %v2915_v26 }
0x1371   : > { %v2917_v29 = vsel %vm644_vm0, %v2916_v27, 0.0 }
0x1372   : > { %2918 = vadd.xlane.f32.xlu1 %v2917_v29 }
0x13ff   : > { %v2919_v32 = vpop.xlane.xlu1 %2918 }
0x1400   : > { %v2920_v34 = vmul.f32 0.03125, %v2919_v32 }
0x1402   : > { %v2921_v36 = vadd.f32 1e-12, %v2920_v34 }
0x1404   : > { %3731 = vrsqrt.f32 %v2921_v36 }
0x140e   : > { %v3732_v35 = vpop.eup %3731 }
0x140f   : > { %v2923_v28 = vmul.f32 %v3732_v35, %v2915_v26 }
0x1411   : > { %v2930_v39 = vmul.f32 %v3273_v37, %v2923_v28 }
0x1413   : > { %v2937_v33 = vadd.f32 %v3274_v38, %v2930_v39 }
0x1415   : > { %v2942_v40 = vpack.c.bf16 %v2937_v33, %v2937_v33 }
0x1417   : > { %3632 = vmatmul.mubr.msk.bf16.vlgmr.msra.gmra.mrb[68].mxu1 %vm644_vm0, %v2942_v40 }
0x1418   : > { %3639 = vmatprep.mubr.msk.bf16.mxu1 %vm3744_vm1, %v3743_v9  ;;  %3636 = vmatpush3.bf16.msra.mxu1 %v3685_v41 }
0x1419   : > { %3637 = vmatprep.subr.bf16.mxu1 %v3743_v9  ;;  %v3279_v9 = vld [vmem:[%s4401_s19] ss:$0 sm:$0xff] }
0x141c   : > { %3638 = vmatpush3.bf16.msra.mxu1 %v3686_v42 }
0x14ea   : > { %v2999_v44 = vpop.f32.mrb[68].mxu1 }
0x14eb   : > { %v3000_v45 = vadd.f32 %v3275_v43, %v2999_v44  ;;  %v3633_v46 = vpop.f32.mrb[69].mxu1 }
0x14ec   : > { %v3002_v47 = vpop.f32.mrb[70].mxu1 }
0x14ed   : > { %3733 = vtanh.f32 %v3000_v45  ;;  %v3634_v48 = vpop.f32.mrb[71].mxu1 }
0x14f7   : > { %v3734_v0 = vpop.eup %3733 }
0x14f8   : > { %v3010_v49 = vpack.c.bf16 %v3734_v0, %v3734_v0 }
0x14fa   : > { %3640 = vmatmul.mubr.msk.bf16.vlgmr.msra.gmra.mrb[72].mxu1 %vm644_vm0, %v3010_v49 }
0x15cd   : > { %v3067_v52 = vpop.f32.mrb[72].mxu1 }
0x15ce   : > { %v3068_v53 = vadd.f32 %v3279_v9, %v3067_v52  ;;  %v3641_v54 = vpop.f32.mrb[73].mxu1 }
0x15cf   : > { %v3070_v55 = vpop.f32.mrb[74].mxu1 }
0x15d0   : > { %3073 = vst [vmem:[%s638_s3] sm:$0xff] %v3068_v53  ;;  %v3642_v56 = vpop.f32.mrb[75].mxu1 }
0x15d1 PF: > { %s30_s1 = sadd.s32 1, %s3741_s1  }
0x15d2   : > { %p27_p4 = scmp.ge.s32.totalorder %s30_s1, 4  }
0x15d4   :  { %29 = sbr.rel (!%p27_p4) target bundleno = 6 (0x6), region = 145 }

</bundles_post_ra>
